<compile_context>
chip_gen: v7x
topology: tpu7x:2x2x1
jax: 0.10.0
libtpu: 0.0.40
codegen_flags: <defaults>
</compile_context>

<pallas_src>
import functools
import math

import jax
import jax.numpy as jnp
from jax import lax
from jax.experimental import pallas as pl
from jax.experimental.pallas import tpu as pltpu


# Safe on every generation (v7x has 64 MiB physical VMEM); the tiles below are
# sized so the double-buffered footprint stays well under this limit, so a
# larger per-chip limit would not change behaviour.
_VMEM_LIMIT = 48 * 1024 * 1024


def _round_up(x, m):
    return ((x + m - 1) // m) * m


def _tile(dim, target, floor):
    """Largest power-of-two-ish tile <= target that evenly divides dim.

    Used only for weight/model dims (which are 128-friendly in practice);
    the row dim M is handled by explicit padding in the wrappers instead of
    falling back to a full-extent block.
    """
    if dim <= target:
        return dim
    t = target
    while t >= floor:
        if dim % t == 0:
            return t
        t //= 2
    return dim


def _pad_rows(x2, mp):
    m = x2.shape[0]
    if mp == m:
        return x2
    return jnp.pad(x2, ((0, mp - m), (0, 0)))


# ----------------------------------------------------------------------------
# Pallas kernels
# ----------------------------------------------------------------------------

def _linear_kernel(x_ref, w_ref, b_ref, o_ref, acc_ref, *, activation):
    # x: (tm, tk) bf16, w: (tk, tn) bf16, b: (1, tn) f32.
    # f32 accumulation in VMEM scratch; bias (+ optional GELU) fused epilogue.
    @pl.when(pl.program_id(2) == 0)
    def _():
        acc_ref[...] = jnp.zeros_like(acc_ref)

    acc_ref[...] += jnp.dot(x_ref[...], w_ref[...],
                            preferred_element_type=jnp.float32)

    @pl.when(pl.program_id(2) == pl.num_programs(2) - 1)
    def _():
        y = acc_ref[...] + b_ref[...]
        if activation == "gelu":
            # TODO(synk): tanh-approximate GELU fused in-kernel; PyTorch uses
            # the exact erf form (difference is ~1e-3 absolute).
            c = 0.7978845608028654  # sqrt(2/pi)
            y = 0.5 * y * (1.0 + jnp.tanh(c * (y + 0.044715 * y * y * y)))
        o_ref[...] = y.astype(o_ref.dtype)


def _ln_body(x, g, b):
    # LayerNorm over the last dim, eps=1e-5, biased variance (matches torch).
    mu = jnp.mean(x, axis=-1, keepdims=True)
    d = x - mu
    var = jnp.mean(d * d, axis=-1, keepdims=True)
    return d * jax.lax.rsqrt(var + 1e-5) * g + b


def _layernorm_kernel(x_ref, g_ref, b_ref, o_ref):
    o_ref[...] = _ln_body(x_ref[...].astype(jnp.float32),
                          g_ref[...], b_ref[...]).astype(o_ref.dtype)


def _linear_add_ln_kernel(x_ref, w_ref, b_ref, r_ref, g_ref, bt_ref,
                          o_ref, acc_ref):
    # Fused: LayerNorm((x @ w + b) + residual).  N is untiled (full d_model)
    # so per-row mean/var are computable on the resident f32 accumulator —
    # no intermediate (M, d_model) f32 HBM round trip.
    @pl.when(pl.program_id(1) == 0)
    def _():
        acc_ref[...] = jnp.zeros_like(acc_ref)

    acc_ref[...] += jnp.dot(x_ref[...], w_ref[...],
                            preferred_element_type=jnp.float32)

    @pl.when(pl.program_id(1) == pl.num_programs(1) - 1)
    def _():
        y = acc_ref[...] + b_ref[...] + r_ref[...].astype(jnp.float32)
        o_ref[...] = _ln_body(y, g_ref[...], bt_ref[...]).astype(o_ref.dtype)


def _mha_kernel(qkv_ref, bias_ref, o_ref, *, n_heads, d_k, tq, inv_scale):
    # One (batch, query-block) per grid step; all heads handled inside via
    # per-head Ref slices, so only (tq, d_k)/(L, d_k) tiles are ever live in
    # vregs (never the full QKV block -> no register spills at real L).
    # Per-head lane offsets (h*d_k) may be 64-lane aligned for d_k=64; the
    # lane realignment on those loads/stores goes to the XLU, which has slack.
    dmk = n_heads * d_k
    if tq % 8 == 0:
        row0 = pl.multiple_of(pl.program_id(1) * tq, 8)
    else:
        row0 = pl.program_id(1) * tq
    bias = bias_ref[0]                      # (1, L) additive pad mask (f32)
    for h in range(n_heads):                # static unroll over heads
        # Fold inv_scale into Q (L/d_k fewer VPU multiplies than scaling S).
        q = qkv_ref[0, pl.ds(row0, tq), pl.ds(h * d_k, d_k)] * inv_scale
        k = qkv_ref[0, :, pl.ds(dmk + h * d_k, d_k)]
        v = qkv_ref[0, :, pl.ds(2 * dmk + h * d_k, d_k)]
        # Contract last dims directly (no explicit K transpose).
        s = lax.dot_general(q, k, (((1,), (1,)), ((), ())),
                            preferred_element_type=jnp.float32)
        s = s + bias
        m = jnp.max(s, axis=-1, keepdims=True)
        e = jnp.exp(s - m)
        p = e * pl.reciprocal(jnp.sum(e, axis=-1, keepdims=True), approx=True)
        ctx = jnp.dot(p.astype(v.dtype), v, preferred_element_type=jnp.float32)
        o_ref[0, :, h * d_k:(h + 1) * d_k] = ctx.astype(o_ref.dtype)


# ----------------------------------------------------------------------------
# Wrappers around pallas_call
# ----------------------------------------------------------------------------

def linear(x, w, b, *, activation=None, out_dtype=jnp.bfloat16,
           tile_m=512, tile_n=1024, tile_k=2048):
    """y = act(x @ w + b); w is pre-transposed (din, dout), stored bf16."""
    lead = x.shape[:-1]
    K = x.shape[-1]
    N = w.shape[-1]
    x2 = x.reshape(-1, K)
    if x2.dtype != jnp.bfloat16:
        x2 = x2.astype(jnp.bfloat16)        # bf16 activation stream -> MXU
    M = x2.shape[0]

    tm = min(tile_m, _round_up(M, 8))
    Mp = _round_up(M, tm)                   # pad rows instead of full-M blocks
    x2 = _pad_rows(x2, Mp)
    tn = _tile(N, tile_n, 128)
    tk = _tile(K, tile_k, 128)              # single full-K step when K <= 2048
    grid = (Mp // tm, N // tn, K // tk)

    kern = functools.partial(_linear_kernel, activation=activation)
    out = pl.pallas_call(
        kern,
        out_shape=jax.ShapeDtypeStruct((Mp, N), out_dtype),
        grid=grid,
        in_specs=[
            pl.BlockSpec((tm, tk), lambda i, j, k: (i, k)),
            pl.BlockSpec((tk, tn), lambda i, j, k: (k, j)),
            pl.BlockSpec((1, tn), lambda i, j, k: (0, j)),
        ],
        out_specs=pl.BlockSpec((tm, tn), lambda i, j, k: (i, j)),
        scratch_shapes=[pltpu.VMEM((tm, tn), jnp.float32)],
        compiler_params=pltpu.CompilerParams(
            dimension_semantics=("parallel", "parallel", "arbitrary"),
            vmem_limit_bytes=_VMEM_LIMIT,
        ),
    )(x2, w, b.reshape(1, N))
    if Mp != M:
        out = out[:M]
    return out.reshape(*lead, N)


def linear_add_ln(x, w, b, residual, gamma, beta, *, out_dtype=jnp.bfloat16,
                  tile_m=512, tile_k=2048):
    """LayerNorm(x @ w + b + residual), fused (Wo projection epilogue)."""
    lead = x.shape[:-1]
    K = x.shape[-1]
    N = w.shape[-1]
    x2 = x.reshape(-1, K)
    r2 = residual.reshape(-1, N)
    if x2.dtype != jnp.bfloat16:
        x2 = x2.astype(jnp.bfloat16)
    M = x2.shape[0]

    tm = min(tile_m, _round_up(M, 8))
    Mp = _round_up(M, tm)
    x2 = _pad_rows(x2, Mp)
    r2 = _pad_rows(r2, Mp)
    tk = _tile(K, tile_k, 128)
    grid = (Mp // tm, K // tk)

    out = pl.pallas_call(
        _linear_add_ln_kernel,
        out_shape=jax.ShapeDtypeStruct((Mp, N), out_dtype),
        grid=grid,
        in_specs=[
            pl.BlockSpec((tm, tk), lambda i, k: (i, k)),
            pl.BlockSpec((tk, N), lambda i, k: (k, 0)),
            pl.BlockSpec((1, N), lambda i, k: (0, 0)),
            pl.BlockSpec((tm, N), lambda i, k: (i, 0)),
            pl.BlockSpec((1, N), lambda i, k: (0, 0)),
            pl.BlockSpec((1, N), lambda i, k: (0, 0)),
        ],
        out_specs=pl.BlockSpec((tm, N), lambda i, k: (i, 0)),
        scratch_shapes=[pltpu.VMEM((tm, N), jnp.float32)],
        compiler_params=pltpu.CompilerParams(
            dimension_semantics=("parallel", "arbitrary"),
            vmem_limit_bytes=_VMEM_LIMIT,
        ),
    )(x2, w, b.reshape(1, N), r2, gamma.reshape(1, N), beta.reshape(1, N))
    if Mp != M:
        out = out[:M]
    return out.reshape(*lead, N)


def layernorm(x, gamma, beta, *, out_dtype=jnp.bfloat16, tile_m=512):
    """Row-tiled LayerNorm over the last dim (embedding norm)."""
    lead = x.shape[:-1]
    d = x.shape[-1]
    x2 = x.reshape(-1, d)
    M = x2.shape[0]
    tm = min(tile_m, _round_up(M, 8))
    Mp = _round_up(M, tm)
    x2 = _pad_rows(x2, Mp)
    grid = (Mp // tm,)

    row_spec = pl.BlockSpec((tm, d), lambda i: (i, 0))
    vec_spec = pl.BlockSpec((1, d), lambda i: (0, 0))
    out = pl.pallas_call(
        _layernorm_kernel,
        out_shape=jax.ShapeDtypeStruct((Mp, d), out_dtype),
        grid=grid,
        in_specs=[row_spec, vec_spec, vec_spec],
        out_specs=row_spec,
        compiler_params=pltpu.CompilerParams(
            dimension_semantics=("parallel",),
            vmem_limit_bytes=_VMEM_LIMIT,
        ),
    )(x2, gamma.reshape(1, d), beta.reshape(1, d))
    if Mp != M:
        out = out[:M]
    return out.reshape(*lead, d)


def multi_head_attention(qkv, pad_bias, *, n_heads, d_k):
    """qkv: (B, L, 3*H*dk) bf16 [Q heads | K heads | V heads],
    pad_bias: (B, 1, L) f32 -> (B, L, H*dk) bf16."""
    B, L, three_dmk = qkv.shape
    dmk = n_heads * d_k
    tq = _tile(L, 128, 8)                   # query-block tile (second grid axis)
    nq = L // tq
    kern = functools.partial(_mha_kernel, n_heads=n_heads, d_k=d_k, tq=tq,
                             inv_scale=1.0 / math.sqrt(d_k))
    return pl.pallas_call(
        kern,
        out_shape=jax.ShapeDtypeStruct((B, L, dmk), jnp.bfloat16),
        grid=(B, nq),
        in_specs=[
            # Full-L QKV block; index constant in the query axis, so it is
            # DMA'd once per batch element (no re-reads across query blocks).
            pl.BlockSpec((1, L, three_dmk), lambda b, qi: (b, 0, 0)),
            pl.BlockSpec((1, 1, L), lambda b, qi: (b, 0, 0)),
        ],
        out_specs=pl.BlockSpec((1, tq, dmk), lambda b, qi: (b, qi, 0)),
        compiler_params=pltpu.CompilerParams(
            dimension_semantics=("parallel", "parallel"),
            vmem_limit_bytes=_VMEM_LIMIT,
        ),
    )(qkv, pad_bias)


# ----------------------------------------------------------------------------
# Model (forward pass only, matching BERT.forward semantics)
# ----------------------------------------------------------------------------

def encoder_layer(x, pad_bias, p, *, n_heads, d_k):
    # MultiHeadAttention with fused QKV projection (bf16 MXU, f32 accumulate).
    qkv = linear(x, p["Wqkv"], p["bqkv"])
    ctx = multi_head_attention(qkv, pad_bias, n_heads=n_heads, d_k=d_k)
    # Output projection + residual add + LayerNorm fused into one kernel.
    x = linear_add_ln(ctx, p["Wo"], p["bo"], x, p["ln_g"], p["ln_b"])
    # PoswiseFeedForwardNet: fc2(gelu(fc1(x))) -- no residual / norm, exactly
    # as in the reference PyTorch code. GELU is fused into the fc1 epilogue.
    h = linear(x, p["W1"], p["b1"], activation="gelu")
    return linear(h, p["W2"], p["b2"])


def bert_forward(params, input_ids, segment_ids, masked_pos, *, n_heads, d_k):
    # masked_pos is accepted but unused, exactly like BERT.forward in PyTorch.
    del masked_pos
    B, L = input_ids.shape

    # Embedding (gathers are plain-JAX glue; the LayerNorm is a Pallas kernel).
    pos = jnp.broadcast_to(jnp.arange(L, dtype=jnp.int32)[None, :], (B, L))
    emb = (
        params["tok_embed"][input_ids]
        + params["pos_embed"][pos]
        + params["seg_embed"][segment_ids]
    )
    out = layernorm(emb, params["emb_gamma"], params["emb_beta"])

    # get_attn_pad_mask -> additive bias (B, 1, L): -1e9 where the key token
    # id == 0, broadcast over query rows inside the attention kernel.
    pad_bias = jnp.where(input_ids == 0,
                         jnp.float32(-1e9), jnp.float32(0.0))[:, None, :]

    for lp in params["layers"]:
        out = encoder_layer(out, pad_bias, lp, n_heads=n_heads, d_k=d_k)
    return out.astype(jnp.float32)


# ----------------------------------------------------------------------------
# Parameter initialization.
#   * Linear weights are initialized in torch convention (dout, din) with
#     U(-1/sqrt(din), 1/sqrt(din)), stored pre-transposed (din, dout) in bf16
#     for the MXU; biases / LayerNorm params stay f32.
#   * Q/K/V weights are fused into a single (d_model, 3*H*dk) matrix.
#   * The Linear / LayerNorm that PyTorch MultiHeadAttention creates *inside
#     forward* are treated here as fixed per-layer parameters.
#   * The unused heads (fc / classifier / decoder) are not needed by forward.
# ----------------------------------------------------------------------------

def init_params(key, *, n_layers, n_heads, d_model, d_ff, d_k,
                n_segments, vocab_size, max_len):
    def dense(k, dout, din):
        kw, kb = jax.random.split(k)
        lim = 1.0 / math.sqrt(din)
        w = jax.random.uniform(kw, (dout, din), jnp.float32, -lim, lim)
        b = jax.random.uniform(kb, (dout,), jnp.float32, -lim, lim)
        return w.T.astype(jnp.bfloat16), b  # pre-transposed, bf16 weight

    keys = jax.random.split(key, 3 + n_layers)
    params = dict(
        tok_embed=jax.random.normal(keys[0], (vocab_size, d_model), jnp.float32),
        pos_embed=jax.random.normal(keys[1], (max_len, d_model), jnp.float32),
        seg_embed=jax.random.normal(keys[2], (n_segments, d_model), jnp.float32),
        emb_gamma=jnp.ones((d_model,), jnp.float32),
        emb_beta=jnp.zeros((d_model,), jnp.float32),
        layers=[],
    )
    dmk = n_heads * d_k
    for i in range(n_layers):
        lk = jax.random.split(keys[3 + i], 6)
        Wq, bq = dense(lk[0], dmk, d_model)
        Wk, bk = dense(lk[1], dmk, d_model)
        Wv, bv = dense(lk[2], dmk, d_model)
        Wo, bo = dense(lk[3], d_model, dmk)
        W1, b1 = dense(lk[4], d_ff, d_model)
        W2, b2 = dense(lk[5], d_model, d_ff)
        params["layers"].append(dict(
            Wqkv=jnp.concatenate([Wq, Wk, Wv], axis=1),   # (d_model, 3*dmk)
            bqkv=jnp.concatenate([bq, bk, bv], axis=0),   # (3*dmk,)
            Wo=Wo, bo=bo,
            ln_g=jnp.ones((d_model,), jnp.float32),
            ln_b=jnp.zeros((d_model,), jnp.float32),
            W1=W1, b1=b1, W2=W2, b2=b2,
        ))
    return params


if __name__ == "__main__":
    # Small, forward-consistent shapes.
    n_layers, n_heads, d_model, d_ff, d_k = 2, 2, 32, 64, 16
    n_segments, vocab_size, max_len = 2, 50, 16
    B, L = 2, 8

    key = jax.random.PRNGKey(0)
    pkey, ikey, mkey = jax.random.split(key, 3)

    params = init_params(
        pkey, n_layers=n_layers, n_heads=n_heads, d_model=d_model, d_ff=d_ff,
        d_k=d_k, n_segments=n_segments, vocab_size=vocab_size, max_len=max_len)

    input_ids = jax.random.randint(ikey, (B, L), 1, vocab_size, dtype=jnp.int32)
    input_ids = input_ids.at[:, -2:].set(0)  # PAD tokens -> exercises the mask
    segment_ids = jnp.concatenate(
        [jnp.zeros((B, L // 2), jnp.int32), jnp.ones((B, L // 2), jnp.int32)],
        axis=1)
    masked_pos = jax.random.randint(mkey, (B, 3), 0, L, dtype=jnp.int32)  # unused

    fwd = jax.jit(functools.partial(bert_forward, n_heads=n_heads, d_k=d_k))
    out = fwd(params, input_ids, segment_ids, masked_pos)
    out = jax.block_until_ready(out)

    assert out.shape == (B, L, d_model) and out.dtype == jnp.float32
    assert bool(jnp.all(jnp.isfinite(out)))
    print("KERNEL_OK")
</pallas_src>

<mosaic_0001>
module attributes {stable_mosaic.version = 11 : i64} {
  func.func @_layernorm_kernel(%arg0: i32, %arg1: memref<16x32xf32, #tpu.memory_space<vmem>>, %arg2: memref<1x32xf32, #tpu.memory_space<vmem>>, %arg3: memref<1x32xf32, #tpu.memory_space<vmem>>, %arg4: memref<16x32xbf16, #tpu.memory_space<vmem>>) attributes {dimension_semantics = [#tpu.dimension_semantics<parallel>], iteration_bounds = array<i64: 1>, scalar_prefetch = 0 : i64, scratch_operands = 0 : i64, tpu.core_type = #tpu.core_type<tc>, window_params = [{transform_indices = @transform_0, window_bounds = array<i64: 16, 32>}, {pipeline_mode = #tpu.pipeline_mode<synchronous>, transform_indices = @transform_1, window_bounds = array<i64: 1, 32>}, {pipeline_mode = #tpu.pipeline_mode<synchronous>, transform_indices = @transform_2, window_bounds = array<i64: 1, 32>}, {transform_indices = @transform_3, window_bounds = array<i64: 16, 32>}]} {
    %c0 = arith.constant 0 : index
    %c0_0 = arith.constant 0 : index
    %0 = vector.load %arg1[%c0, %c0_0] : memref<16x32xf32, #tpu.memory_space<vmem>>, vector<16x32xf32>
    %c0_1 = arith.constant 0 : index
    %c0_2 = arith.constant 0 : index
    %1 = vector.load %arg2[%c0_1, %c0_2] : memref<1x32xf32, #tpu.memory_space<vmem>>, vector<1x32xf32>
    %c0_3 = arith.constant 0 : index
    %c0_4 = arith.constant 0 : index
    %2 = vector.load %arg3[%c0_3, %c0_4] : memref<1x32xf32, #tpu.memory_space<vmem>>, vector<1x32xf32>
    %cst = arith.constant dense<0.000000e+00> : vector<16xf32>
    %3 = vector.multi_reduction <add>, %0, %cst [1] : vector<16x32xf32> to vector<16xf32>
    %4 = vector.shape_cast %3 : vector<16xf32> to vector<16x1xf32>
    %cst_5 = arith.constant 3.200000e+01 : f32
    %5 = vector.broadcast %cst_5 : f32 to vector<16x1xf32>
    %6 = arith.divf %4, %5 : vector<16x1xf32>
    %7 = vector.broadcast %6 : vector<16x1xf32> to vector<16x32xf32>
    %8 = arith.subf %0, %7 : vector<16x32xf32>
    %9 = arith.mulf %8, %8 : vector<16x32xf32>
    %cst_6 = arith.constant dense<0.000000e+00> : vector<16xf32>
    %10 = vector.multi_reduction <add>, %9, %cst_6 [1] : vector<16x32xf32> to vector<16xf32>
    %11 = vector.shape_cast %10 : vector<16xf32> to vector<16x1xf32>
    %cst_7 = arith.constant 3.200000e+01 : f32
    %12 = vector.broadcast %cst_7 : f32 to vector<16x1xf32>
    %13 = arith.divf %11, %12 : vector<16x1xf32>
    %cst_8 = arith.constant 9.99999974E-6 : f32
    %14 = vector.broadcast %cst_8 : f32 to vector<16x1xf32>
    %15 = arith.addf %13, %14 : vector<16x1xf32>
    %16 = math.rsqrt %15 : vector<16x1xf32>
    %17 = vector.broadcast %16 : vector<16x1xf32> to vector<16x32xf32>
    %18 = arith.mulf %8, %17 : vector<16x32xf32>
    %19 = vector.broadcast %1 : vector<1x32xf32> to vector<16x32xf32>
    %20 = arith.mulf %18, %19 : vector<16x32xf32>
    %21 = vector.broadcast %2 : vector<1x32xf32> to vector<16x32xf32>
    %22 = arith.addf %20, %21 : vector<16x32xf32>
    %23 = arith.truncf %22 : vector<16x32xf32> to vector<16x32xbf16>
    %c0_9 = arith.constant 0 : index
    %c0_10 = arith.constant 0 : index
    %24 = vector.load %arg4[%c0_9, %c0_10] : memref<16x32xbf16, #tpu.memory_space<vmem>>, vector<16x32xbf16>
    tpu.vector_store %arg4[%c0_9, %c0_10], %23 {strides = array<i32>} : memref<16x32xbf16, #tpu.memory_space<vmem>>, vector<16x32xbf16>,
    return
  }
  func.func @transform_0(%arg0: i32) -> (i32, i32) {
    %c0_i32 = arith.constant 0 : i32
    %c0_i32_0 = arith.constant 0 : i32
    return %arg0, %c0_i32 : i32, i32
  }
  func.func @transform_1(%arg0: i32) -> (i32, i32) {
    %c0_i32 = arith.constant 0 : i32
    %c0_i32_0 = arith.constant 0 : i32
    %c0_i32_1 = arith.constant 0 : i32
    return %c0_i32, %c0_i32_0 : i32, i32
  }
  func.func @transform_2(%arg0: i32) -> (i32, i32) {
    %c0_i32 = arith.constant 0 : i32
    %c0_i32_0 = arith.constant 0 : i32
    %c0_i32_1 = arith.constant 0 : i32
    return %c0_i32, %c0_i32_0 : i32, i32
  }
  func.func @transform_3(%arg0: i32) -> (i32, i32) {
    %c0_i32 = arith.constant 0 : i32
    %c0_i32_0 = arith.constant 0 : i32
    return %arg0, %c0_i32 : i32, i32
  }
}

module attributes {stable_mosaic.version = 11 : i64} {
  func.func @_linear_kernel(%arg0: i32, %arg1: i32, %arg2: i32, %arg3: memref<16x32xbf16, #tpu.memory_space<vmem>>, %arg4: memref<32x96xbf16, #tpu.memory_space<vmem>>, %arg5: memref<1x96xf32, #tpu.memory_space<vmem>>, %arg6: memref<16x96xbf16, #tpu.memory_space<vmem>>, %arg7: memref<16x96xf32, #tpu.memory_space<vmem>>) attributes {dimension_semantics = [#tpu.dimension_semantics<parallel>, #tpu.dimension_semantics<parallel>, #tpu.dimension_semantics<arbitrary>], iteration_bounds = array<i64: 1, 1, 1>, scalar_prefetch = 0 : i64, scratch_operands = 1 : i64, tpu.core_type = #tpu.core_type<tc>, window_params = [{transform_indices = @transform_0, window_bounds = array<i64: 16, 32>}, {transform_indices = @transform_1, window_bounds = array<i64: 32, 96>}, {transform_indices = @transform_2, window_bounds = array<i64: 1, 96>}, {transform_indices = @transform_3, window_bounds = array<i64: 16, 96>}]} {
    %c0_i32 = arith.constant 0 : i32
    %0 = arith.cmpi eq, %arg2, %c0_i32 : i32
    %1 = arith.extui %0 : i1 to i32
    %c0_i32_0 = arith.constant 0 : i32
    %2 = arith.cmpi ne, %1, %c0_i32_0 : i32
    scf.if %2 {
      %cst_10 = arith.constant 0.000000e+00 : f32
      %12 = vector.broadcast %cst_10 : f32 to vector<16x96xf32>
      %c0_11 = arith.constant 0 : index
      %c0_12 = arith.constant 0 : index
      %13 = vector.load %arg7[%c0_11, %c0_12] : memref<16x96xf32, #tpu.memory_space<vmem>>, vector<16x96xf32>
      tpu.vector_store %arg7[%c0_11, %c0_12], %12 {strides = array<i32>} : memref<16x96xf32, #tpu.memory_space<vmem>>, vector<16x96xf32>,
    } else {
    }
    %c0 = arith.constant 0 : index
    %c0_1 = arith.constant 0 : index
    %3 = vector.load %arg7[%c0, %c0_1] : memref<16x96xf32, #tpu.memory_space<vmem>>, vector<16x96xf32>
    %c0_2 = arith.constant 0 : index
    %c0_3 = arith.constant 0 : index
    %4 = vector.load %arg3[%c0_2, %c0_3] : memref<16x32xbf16, #tpu.memory_space<vmem>>, vector<16x32xbf16>
    %c0_4 = arith.constant 0 : index
    %c0_5 = arith.constant 0 : index
    %5 = vector.load %arg4[%c0_4, %c0_5] : memref<32x96xbf16, #tpu.memory_space<vmem>>, vector<32x96xbf16>
    %cst = arith.constant dense<0.000000e+00> : vector<16x96xf32>
    %6 = tpu.matmul %4, %5, %cst {dimension_numbers = #tpu.dot_dimension_numbers<[1], [0], [0], [1], [0, 0, 1, 1], [], []>} : vector<16x32xbf16>, vector<32x96xbf16>, vector<16x96xf32> -> vector<16x96xf32>
    %7 = arith.addf %3, %6 : vector<16x96xf32>
    %c0_6 = arith.constant 0 : index
    %c0_7 = arith.constant 0 : index
    %8 = vector.load %arg7[%c0_6, %c0_7] : memref<16x96xf32, #tpu.memory_space<vmem>>, vector<16x96xf32>
    tpu.vector_store %arg7[%c0_6, %c0_7], %7 {strides = array<i32>} : memref<16x96xf32, #tpu.memory_space<vmem>>, vector<16x96xf32>,
    %c0_i32_8 = arith.constant 0 : i32
    %9 = arith.cmpi eq, %arg2, %c0_i32_8 : i32
    %10 = arith.extui %9 : i1 to i32
    %c0_i32_9 = arith.constant 0 : i32
    %11 = arith.cmpi ne, %10, %c0_i32_9 : i32
    scf.if %11 {
      %c0_10 = arith.constant 0 : index
      %c0_11 = arith.constant 0 : index
      %12 = vector.load %arg7[%c0_10, %c0_11] : memref<16x96xf32, #tpu.memory_space<vmem>>, vector<16x96xf32>
      %c0_12 = arith.constant 0 : index
      %c0_13 = arith.constant 0 : index
      %13 = vector.load %arg5[%c0_12, %c0_13] : memref<1x96xf32, #tpu.memory_space<vmem>>, vector<1x96xf32>
      %14 = vector.broadcast %13 : vector<1x96xf32> to vector<16x96xf32>
      %15 = arith.addf %12, %14 : vector<16x96xf32>
      %16 = arith.truncf %15 : vector<16x96xf32> to vector<16x96xbf16>
      %c0_14 = arith.constant 0 : index
      %c0_15 = arith.constant 0 : index
      %17 = vector.load %arg6[%c0_14, %c0_15] : memref<16x96xbf16, #tpu.memory_space<vmem>>, vector<16x96xbf16>
      tpu.vector_store %arg6[%c0_14, %c0_15], %16 {strides = array<i32>} : memref<16x96xbf16, #tpu.memory_space<vmem>>, vector<16x96xbf16>,
    } else {
    }
    return
  }
  func.func @transform_0(%arg0: i32, %arg1: i32, %arg2: i32) -> (i32, i32) {
    %c0_i32 = arith.constant 0 : i32
    return %arg0, %arg2 : i32, i32
  }
  func.func @transform_1(%arg0: i32, %arg1: i32, %arg2: i32) -> (i32, i32) {
    %c0_i32 = arith.constant 0 : i32
    return %arg2, %arg1 : i32, i32
  }
  func.func @transform_2(%arg0: i32, %arg1: i32, %arg2: i32) -> (i32, i32) {
    %c0_i32 = arith.constant 0 : i32
    %c0_i32_0 = arith.constant 0 : i32
    return %c0_i32, %arg1 : i32, i32
  }
  func.func @transform_3(%arg0: i32, %arg1: i32, %arg2: i32) -> (i32, i32) {
    %c0_i32 = arith.constant 0 : i32
    return %arg0, %arg1 : i32, i32
  }
}

module attributes {stable_mosaic.version = 11 : i64} {
  func.func @_mha_kernel(%arg0: i32, %arg1: i32, %arg2: memref<1x8x96xbf16, #tpu.memory_space<vmem>>, %arg3: memref<1x1x8xf32, #tpu.memory_space<vmem>>, %arg4: memref<1x8x32xbf16, #tpu.memory_space<vmem>>) attributes {dimension_semantics = [#tpu.dimension_semantics<parallel>, #tpu.dimension_semantics<parallel>], iteration_bounds = array<i64: 2, 1>, scalar_prefetch = 0 : i64, scratch_operands = 0 : i64, tpu.core_type = #tpu.core_type<tc>, window_params = [{transform_indices = @transform_0, window_bounds = array<i64: 1, 8, 96>}, {transform_indices = @transform_1, window_bounds = array<i64: 1, 1, 8>}, {transform_indices = @transform_2, window_bounds = array<i64: 1, 8, 32>}]} {
    %c8_i32 = arith.constant 8 : i32
    %0 = arith.muli %arg1, %c8_i32 : i32
    %1 = tpu.assume_multiple %0, 8 : i32
    %c0 = arith.constant 0 : index
    %c0_0 = arith.constant 0 : index
    %c0_1 = arith.constant 0 : index
    %2 = vector.load %arg3[%c0, %c0_0, %c0_1] : memref<1x1x8xf32, #tpu.memory_space<vmem>>, vector<1x1x8xf32>
    %3 = vector.shape_cast %2 : vector<1x1x8xf32> to vector<1x8xf32>
    %c0_2 = arith.constant 0 : index
    %4 = arith.index_cast %1 : i32 to index
    %c0_3 = arith.constant 0 : index
    %5 = vector.load %arg2[%c0_2, %4, %c0_3] : memref<1x8x96xbf16, #tpu.memory_space<vmem>>, vector<1x8x16xbf16>
    %6 = vector.shape_cast %5 : vector<1x8x16xbf16> to vector<8x16xbf16>
    %cst = arith.constant 2.500000e-01 : bf16
    %7 = vector.broadcast %cst : bf16 to vector<8x16xbf16>
    %8 = arith.mulf %6, %7 : vector<8x16xbf16>
    %c0_4 = arith.constant 0 : index
    %c0_5 = arith.constant 0 : index
    %c32 = arith.constant 32 : index
    %9 = vector.load %arg2[%c0_4, %c0_5, %c32] : memref<1x8x96xbf16, #tpu.memory_space<vmem>>, vector<1x8x16xbf16>
    %10 = vector.shape_cast %9 : vector<1x8x16xbf16> to vector<8x16xbf16>
    %c0_6 = arith.constant 0 : index
    %c0_7 = arith.constant 0 : index
    %c64 = arith.constant 64 : index
    %11 = vector.load %arg2[%c0_6, %c0_7, %c64] : memref<1x8x96xbf16, #tpu.memory_space<vmem>>, vector<1x8x16xbf16>
    %12 = vector.shape_cast %11 : vector<1x8x16xbf16> to vector<8x16xbf16>
    %cst_8 = arith.constant dense<0.000000e+00> : vector<8x8xf32>
    %13 = tpu.matmul %8, %10, %cst_8 {dimension_numbers = #tpu.dot_dimension_numbers<[1], [1], [0], [0], [0, 0, 1, 0], [], []>} : vector<8x16xbf16>, vector<8x16xbf16>, vector<8x8xf32> -> vector<8x8xf32>
    %14 = vector.broadcast %3 : vector<1x8xf32> to vector<8x8xf32>
    %15 = arith.addf %13, %14 : vector<8x8xf32>
    %cst_9 = arith.constant dense<0xFF800000> : vector<8xf32>
    %16 = vector.multi_reduction <maximumf>, %15, %cst_9 [1] : vector<8x8xf32> to vector<8xf32>
    %17 = vector.shape_cast %16 : vector<8xf32> to vector<8x1xf32>
    %18 = vector.broadcast %17 : vector<8x1xf32> to vector<8x8xf32>
    %19 = arith.subf %15, %18 : vector<8x8xf32>
    %20 = math.exp %19 : vector<8x8xf32>
    %cst_10 = arith.constant dense<0.000000e+00> : vector<8xf32>
    %21 = vector.multi_reduction <add>, %20, %cst_10 [1] : vector<8x8xf32> to vector<8xf32>
    %22 = vector.shape_cast %21 : vector<8xf32> to vector<8x1xf32>
    %23 = tpu.reciprocal %22 {approx = true} : vector<8x1xf32> -> vector<8x1xf32>
    %24 = vector.broadcast %23 : vector<8x1xf32> to vector<8x8xf32>
    %25 = arith.mulf %20, %24 : vector<8x8xf32>
    %26 = arith.truncf %25 : vector<8x8xf32> to vector<8x8xbf16>
    %cst_11 = arith.constant dense<0.000000e+00> : vector<8x16xf32>
    %27 = tpu.matmul %26, %12, %cst_11 {dimension_numbers = #tpu.dot_dimension_numbers<[1], [0], [0], [1], [0, 0, 1, 1], [], []>} : vector<8x8xbf16>, vector<8x16xbf16>, vector<8x16xf32> -> vector<8x16xf32>
    %28 = arith.truncf %27 : vector<8x16xf32> to vector<8x16xbf16>
    %c0_12 = arith.constant 0 : index
    %c0_13 = arith.constant 0 : index
    %c0_14 = arith.constant 0 : index
    %29 = vector.load %arg4[%c0_12, %c0_13, %c0_14] : memref<1x8x32xbf16, #tpu.memory_space<vmem>>, vector<1x8x16xbf16>
    %30 = vector.shape_cast %29 : vector<1x8x16xbf16> to vector<8x16xbf16>
    %31 = vector.shape_cast %28 : vector<8x16xbf16> to vector<1x8x16xbf16>
    tpu.vector_store %arg4[%c0_12, %c0_13, %c0_14], %31 {strides = array<i32>} : memref<1x8x32xbf16, #tpu.memory_space<vmem>>, vector<1x8x16xbf16>,
    %c0_15 = arith.constant 0 : index
    %32 = arith.index_cast %1 : i32 to index
    %c16 = arith.constant 16 : index
    %33 = vector.load %arg2[%c0_15, %32, %c16] : memref<1x8x96xbf16, #tpu.memory_space<vmem>>, vector<1x8x16xbf16>
    %34 = vector.shape_cast %33 : vector<1x8x16xbf16> to vector<8x16xbf16>
    %cst_16 = arith.constant 2.500000e-01 : bf16
    %35 = vector.broadcast %cst_16 : bf16 to vector<8x16xbf16>
    %36 = arith.mulf %34, %35 : vector<8x16xbf16>
    %c0_17 = arith.constant 0 : index
    %c0_18 = arith.constant 0 : index
    %c48 = arith.constant 48 : index
    %37 = vector.load %arg2[%c0_17, %c0_18, %c48] : memref<1x8x96xbf16, #tpu.memory_space<vmem>>, vector<1x8x16xbf16>
    %38 = vector.shape_cast %37 : vector<1x8x16xbf16> to vector<8x16xbf16>
    %c0_19 = arith.constant 0 : index
    %c0_20 = arith.constant 0 : index
    %c80 = arith.constant 80 : index
    %39 = vector.load %arg2[%c0_19, %c0_20, %c80] : memref<1x8x96xbf16, #tpu.memory_space<vmem>>, vector<1x8x16xbf16>
    %40 = vector.shape_cast %39 : vector<1x8x16xbf16> to vector<8x16xbf16>
    %cst_21 = arith.constant dense<0.000000e+00> : vector<8x8xf32>
    %41 = tpu.matmul %36, %38, %cst_21 {dimension_numbers = #tpu.dot_dimension_numbers<[1], [1], [0], [0], [0, 0, 1, 0], [], []>} : vector<8x16xbf16>, vector<8x16xbf16>, vector<8x8xf32> -> vector<8x8xf32>
    %42 = vector.broadcast %3 : vector<1x8xf32> to vector<8x8xf32>
    %43 = arith.addf %41, %42 : vector<8x8xf32>
    %cst_22 = arith.constant dense<0xFF800000> : vector<8xf32>
    %44 = vector.multi_reduction <maximumf>, %43, %cst_22 [1] : vector<8x8xf32> to vector<8xf32>
    %45 = vector.shape_cast %44 : vector<8xf32> to vector<8x1xf32>
    %46 = vector.broadcast %45 : vector<8x1xf32> to vector<8x8xf32>
    %47 = arith.subf %43, %46 : vector<8x8xf32>
    %48 = math.exp %47 : vector<8x8xf32>
    %cst_23 = arith.constant dense<0.000000e+00> : vector<8xf32>
    %49 = vector.multi_reduction <add>, %48, %cst_23 [1] : vector<8x8xf32> to vector<8xf32>
    %50 = vector.shape_cast %49 : vector<8xf32> to vector<8x1xf32>
    %51 = tpu.reciprocal %50 {approx = true} : vector<8x1xf32> -> vector<8x1xf32>
    %52 = vector.broadcast %51 : vector<8x1xf32> to vector<8x8xf32>
    %53 = arith.mulf %48, %52 : vector<8x8xf32>
    %54 = arith.truncf %53 : vector<8x8xf32> to vector<8x8xbf16>
    %cst_24 = arith.constant dense<0.000000e+00> : vector<8x16xf32>
    %55 = tpu.matmul %54, %40, %cst_24 {dimension_numbers = #tpu.dot_dimension_numbers<[1], [0], [0], [1], [0, 0, 1, 1], [], []>} : vector<8x8xbf16>, vector<8x16xbf16>, vector<8x16xf32> -> vector<8x16xf32>
    %56 = arith.truncf %55 : vector<8x16xf32> to vector<8x16xbf16>
    %c0_25 = arith.constant 0 : index
    %c0_26 = arith.constant 0 : index
    %c16_27 = arith.constant 16 : index
    %57 = vector.load %arg4[%c0_25, %c0_26, %c16_27] : memref<1x8x32xbf16, #tpu.memory_space<vmem>>, vector<1x8x16xbf16>
    %58 = vector.shape_cast %57 : vector<1x8x16xbf16> to vector<8x16xbf16>
    %59 = vector.shape_cast %56 : vector<8x16xbf16> to vector<1x8x16xbf16>
    tpu.vector_store %arg4[%c0_25, %c0_26, %c16_27], %59 {strides = array<i32>} : memref<1x8x32xbf16, #tpu.memory_space<vmem>>, vector<1x8x16xbf16>,
    return
  }
  func.func @transform_0(%arg0: i32, %arg1: i32) -> (i32, i32, i32) {
    %c0_i32 = arith.constant 0 : i32
    %c0_i32_0 = arith.constant 0 : i32
    %c0_i32_1 = arith.constant 0 : i32
    return %arg0, %c0_i32, %c0_i32_0 : i32, i32, i32
  }
  func.func @transform_1(%arg0: i32, %arg1: i32) -> (i32, i32, i32) {
    %c0_i32 = arith.constant 0 : i32
    %c0_i32_0 = arith.constant 0 : i32
    %c0_i32_1 = arith.constant 0 : i32
    return %arg0, %c0_i32, %c0_i32_0 : i32, i32, i32
  }
  func.func @transform_2(%arg0: i32, %arg1: i32) -> (i32, i32, i32) {
    %c0_i32 = arith.constant 0 : i32
    %c0_i32_0 = arith.constant 0 : i32
    return %arg0, %arg1, %c0_i32 : i32, i32, i32
  }
}

module attributes {stable_mosaic.version = 11 : i64} {
  func.func @_linear_add_ln_kernel(%arg0: i32, %arg1: i32, %arg2: memref<16x32xbf16, #tpu.memory_space<vmem>>, %arg3: memref<32x32xbf16, #tpu.memory_space<vmem>>, %arg4: memref<1x32xf32, #tpu.memory_space<vmem>>, %arg5: memref<16x32xbf16, #tpu.memory_space<vmem>>, %arg6: memref<1x32xf32, #tpu.memory_space<vmem>>, %arg7: memref<1x32xf32, #tpu.memory_space<vmem>>, %arg8: memref<16x32xbf16, #tpu.memory_space<vmem>>, %arg9: memref<16x32xf32, #tpu.memory_space<vmem>>) attributes {dimension_semantics = [#tpu.dimension_semantics<parallel>, #tpu.dimension_semantics<arbitrary>], iteration_bounds = array<i64: 1, 1>, scalar_prefetch = 0 : i64, scratch_operands = 1 : i64, tpu.core_type = #tpu.core_type<tc>, window_params = [{transform_indices = @transform_0, window_bounds = array<i64: 16, 32>}, {transform_indices = @transform_1, window_bounds = array<i64: 32, 32>}, {pipeline_mode = #tpu.pipeline_mode<synchronous>, transform_indices = @transform_2, window_bounds = array<i64: 1, 32>}, {transform_indices = @transform_3, window_bounds = array<i64: 16, 32>}, {pipeline_mode = #tpu.pipeline_mode<synchronous>, transform_indices = @transform_4, window_bounds = array<i64: 1, 32>}, {pipeline_mode = #tpu.pipeline_mode<synchronous>, transform_indices = @transform_5, window_bounds = array<i64: 1, 32>}, {transform_indices = @transform_6, window_bounds = array<i64: 16, 32>}]} {
    %c0_i32 = arith.constant 0 : i32
    %0 = arith.cmpi eq, %arg1, %c0_i32 : i32
    %1 = arith.extui %0 : i1 to i32
    %c0_i32_0 = arith.constant 0 : i32
    %2 = arith.cmpi ne, %1, %c0_i32_0 : i32
    scf.if %2 {
      %cst_10 = arith.constant 0.000000e+00 : f32
      %12 = vector.broadcast %cst_10 : f32 to vector<16x32xf32>
      %c0_11 = arith.constant 0 : index
      %c0_12 = arith.constant 0 : index
      %13 = vector.load %arg9[%c0_11, %c0_12] : memref<16x32xf32, #tpu.memory_space<vmem>>, vector<16x32xf32>
      tpu.vector_store %arg9[%c0_11, %c0_12], %12 {strides = array<i32>} : memref<16x32xf32, #tpu.memory_space<vmem>>, vector<16x32xf32>,
    } else {
    }
    %c0 = arith.constant 0 : index
    %c0_1 = arith.constant 0 : index
    %3 = vector.load %arg9[%c0, %c0_1] : memref<16x32xf32, #tpu.memory_space<vmem>>, vector<16x32xf32>
    %c0_2 = arith.constant 0 : index
    %c0_3 = arith.constant 0 : index
    %4 = vector.load %arg2[%c0_2, %c0_3] : memref<16x32xbf16, #tpu.memory_space<vmem>>, vector<16x32xbf16>
    %c0_4 = arith.constant 0 : index
    %c0_5 = arith.constant 0 : index
    %5 = vector.load %arg3[%c0_4, %c0_5] : memref<32x32xbf16, #tpu.memory_space<vmem>>, vector<32x32xbf16>
    %cst = arith.constant dense<0.000000e+00> : vector<16x32xf32>
    %6 = tpu.matmul %4, %5, %cst {dimension_numbers = #tpu.dot_dimension_numbers<[1], [0], [0], [1], [0, 0, 1, 1], [], []>} : vector<16x32xbf16>, vector<32x32xbf16>, vector<16x32xf32> -> vector<16x32xf32>
    %7 = arith.addf %3, %6 : vector<16x32xf32>
    %c0_6 = arith.constant 0 : index
    %c0_7 = arith.constant 0 : index
    %8 = vector.load %arg9[%c0_6, %c0_7] : memref<16x32xf32, #tpu.memory_space<vmem>>, vector<16x32xf32>
    tpu.vector_store %arg9[%c0_6, %c0_7], %7 {strides = array<i32>} : memref<16x32xf32, #tpu.memory_space<vmem>>, vector<16x32xf32>,
    %c0_i32_8 = arith.constant 0 : i32
    %9 = arith.cmpi eq, %arg1, %c0_i32_8 : i32
    %10 = arith.extui %9 : i1 to i32
    %c0_i32_9 = arith.constant 0 : i32
    %11 = arith.cmpi ne, %10, %c0_i32_9 : i32
    scf.if %11 {
      %c0_10 = arith.constant 0 : index
      %c0_11 = arith.constant 0 : index
      %12 = vector.load %arg9[%c0_10, %c0_11] : memref<16x32xf32, #tpu.memory_space<vmem>>, vector<16x32xf32>
      %c0_12 = arith.constant 0 : index
      %c0_13 = arith.constant 0 : index
      %13 = vector.load %arg4[%c0_12, %c0_13] : memref<1x32xf32, #tpu.memory_space<vmem>>, vector<1x32xf32>
      %14 = vector.broadcast %13 : vector<1x32xf32> to vector<16x32xf32>
      %15 = arith.addf %12, %14 : vector<16x32xf32>
      %c0_14 = arith.constant 0 : index
      %c0_15 = arith.constant 0 : index
      %16 = vector.load %arg5[%c0_14, %c0_15] : memref<16x32xbf16, #tpu.memory_space<vmem>>, vector<16x32xbf16>
      %17 = arith.extf %16 : vector<16x32xbf16> to vector<16x32xf32>
      %18 = arith.addf %15, %17 : vector<16x32xf32>
      %c0_16 = arith.constant 0 : index
      %c0_17 = arith.constant 0 : index
      %19 = vector.load %arg6[%c0_16, %c0_17] : memref<1x32xf32, #tpu.memory_space<vmem>>, vector<1x32xf32>
      %c0_18 = arith.constant 0 : index
      %c0_19 = arith.constant 0 : index
      %20 = vector.load %arg7[%c0_18, %c0_19] : memref<1x32xf32, #tpu.memory_space<vmem>>, vector<1x32xf32>
      %cst_20 = arith.constant dense<0.000000e+00> : vector<16xf32>
      %21 = vector.multi_reduction <add>, %18, %cst_20 [1] : vector<16x32xf32> to vector<16xf32>
      %22 = vector.shape_cast %21 : vector<16xf32> to vector<16x1xf32>
      %cst_21 = arith.constant 3.200000e+01 : f32
      %23 = vector.broadcast %cst_21 : f32 to vector<16x1xf32>
      %24 = arith.divf %22, %23 : vector<16x1xf32>
      %25 = vector.broadcast %24 : vector<16x1xf32> to vector<16x32xf32>
      %26 = arith.subf %18, %25 : vector<16x32xf32>
      %27 = arith.mulf %26, %26 : vector<16x32xf32>
      %cst_22 = arith.constant dense<0.000000e+00> : vector<16xf32>
      %28 = vector.multi_reduction <add>, %27, %cst_22 [1] : vector<16x32xf32> to vector<16xf32>
      %29 = vector.shape_cast %28 : vector<16xf32> to vector<16x1xf32>
      %cst_23 = arith.constant 3.200000e+01 : f32
      %30 = vector.broadcast %cst_23 : f32 to vector<16x1xf32>
      %31 = arith.divf %29, %30 : vector<16x1xf32>
      %cst_24 = arith.constant 9.99999974E-6 : f32
      %32 = vector.broadcast %cst_24 : f32 to vector<16x1xf32>
      %33 = arith.addf %31, %32 : vector<16x1xf32>
      %34 = math.rsqrt %33 : vector<16x1xf32>
      %35 = vector.broadcast %34 : vector<16x1xf32> to vector<16x32xf32>
      %36 = arith.mulf %26, %35 : vector<16x32xf32>
      %37 = vector.broadcast %19 : vector<1x32xf32> to vector<16x32xf32>
      %38 = arith.mulf %36, %37 : vector<16x32xf32>
      %39 = vector.broadcast %20 : vector<1x32xf32> to vector<16x32xf32>
      %40 = arith.addf %38, %39 : vector<16x32xf32>
      %41 = arith.truncf %40 : vector<16x32xf32> to vector<16x32xbf16>
      %c0_25 = arith.constant 0 : index
      %c0_26 = arith.constant 0 : index
      %42 = vector.load %arg8[%c0_25, %c0_26] : memref<16x32xbf16, #tpu.memory_space<vmem>>, vector<16x32xbf16>
      tpu.vector_store %arg8[%c0_25, %c0_26], %41 {strides = array<i32>} : memref<16x32xbf16, #tpu.memory_space<vmem>>, vector<16x32xbf16>,
    } else {
    }
    return
  }
  func.func @transform_0(%arg0: i32, %arg1: i32) -> (i32, i32) {
    %c0_i32 = arith.constant 0 : i32
    return %arg0, %arg1 : i32, i32
  }
  func.func @transform_1(%arg0: i32, %arg1: i32) -> (i32, i32) {
    %c0_i32 = arith.constant 0 : i32
    %c0_i32_0 = arith.constant 0 : i32
    return %arg1, %c0_i32 : i32, i32
  }
  func.func @transform_2(%arg0: i32, %arg1: i32) -> (i32, i32) {
    %c0_i32 = arith.constant 0 : i32
    %c0_i32_0 = arith.constant 0 : i32
    %c0_i32_1 = arith.constant 0 : i32
    return %c0_i32, %c0_i32_0 : i32, i32
  }
  func.func @transform_3(%arg0: i32, %arg1: i32) -> (i32, i32) {
    %c0_i32 = arith.constant 0 : i32
    %c0_i32_0 = arith.constant 0 : i32
    return %arg0, %c0_i32 : i32, i32
  }
  func.func @transform_4(%arg0: i32, %arg1: i32) -> (i32, i32) {
    %c0_i32 = arith.constant 0 : i32
    %c0_i32_0 = arith.constant 0 : i32
    %c0_i32_1 = arith.constant 0 : i32
    return %c0_i32, %c0_i32_0 : i32, i32
  }
  func.func @transform_5(%arg0: i32, %arg1: i32) -> (i32, i32) {
    %c0_i32 = arith.constant 0 : i32
    %c0_i32_0 = arith.constant 0 : i32
    %c0_i32_1 = arith.constant 0 : i32
    return %c0_i32, %c0_i32_0 : i32, i32
  }
  func.func @transform_6(%arg0: i32, %arg1: i32) -> (i32, i32) {
    %c0_i32 = arith.constant 0 : i32
    %c0_i32_0 = arith.constant 0 : i32
    return %arg0, %c0_i32 : i32, i32
  }
}

module attributes {stable_mosaic.version = 11 : i64} {
  func.func @_linear_kernel(%arg0: i32, %arg1: i32, %arg2: i32, %arg3: memref<16x32xbf16, #tpu.memory_space<vmem>>, %arg4: memref<32x64xbf16, #tpu.memory_space<vmem>>, %arg5: memref<1x64xf32, #tpu.memory_space<vmem>>, %arg6: memref<16x64xbf16, #tpu.memory_space<vmem>>, %arg7: memref<16x64xf32, #tpu.memory_space<vmem>>) attributes {dimension_semantics = [#tpu.dimension_semantics<parallel>, #tpu.dimension_semantics<parallel>, #tpu.dimension_semantics<arbitrary>], iteration_bounds = array<i64: 1, 1, 1>, scalar_prefetch = 0 : i64, scratch_operands = 1 : i64, tpu.core_type = #tpu.core_type<tc>, window_params = [{transform_indices = @transform_0, window_bounds = array<i64: 16, 32>}, {transform_indices = @transform_1, window_bounds = array<i64: 32, 64>}, {transform_indices = @transform_2, window_bounds = array<i64: 1, 64>}, {transform_indices = @transform_3, window_bounds = array<i64: 16, 64>}]} {
    %c0_i32 = arith.constant 0 : i32
    %0 = arith.cmpi eq, %arg2, %c0_i32 : i32
    %1 = arith.extui %0 : i1 to i32
    %c0_i32_0 = arith.constant 0 : i32
    %2 = arith.cmpi ne, %1, %c0_i32_0 : i32
    scf.if %2 {
      %cst_10 = arith.constant 0.000000e+00 : f32
      %12 = vector.broadcast %cst_10 : f32 to vector<16x64xf32>
      %c0_11 = arith.constant 0 : index
      %c0_12 = arith.constant 0 : index
      %13 = vector.load %arg7[%c0_11, %c0_12] : memref<16x64xf32, #tpu.memory_space<vmem>>, vector<16x64xf32>
      tpu.vector_store %arg7[%c0_11, %c0_12], %12 {strides = array<i32>} : memref<16x64xf32, #tpu.memory_space<vmem>>, vector<16x64xf32>,
    } else {
    }
    %c0 = arith.constant 0 : index
    %c0_1 = arith.constant 0 : index
    %3 = vector.load %arg7[%c0, %c0_1] : memref<16x64xf32, #tpu.memory_space<vmem>>, vector<16x64xf32>
    %c0_2 = arith.constant 0 : index
    %c0_3 = arith.constant 0 : index
    %4 = vector.load %arg3[%c0_2, %c0_3] : memref<16x32xbf16, #tpu.memory_space<vmem>>, vector<16x32xbf16>
    %c0_4 = arith.constant 0 : index
    %c0_5 = arith.constant 0 : index
    %5 = vector.load %arg4[%c0_4, %c0_5] : memref<32x64xbf16, #tpu.memory_space<vmem>>, vector<32x64xbf16>
    %cst = arith.constant dense<0.000000e+00> : vector<16x64xf32>
    %6 = tpu.matmul %4, %5, %cst {dimension_numbers = #tpu.dot_dimension_numbers<[1], [0], [0], [1], [0, 0, 1, 1], [], []>} : vector<16x32xbf16>, vector<32x64xbf16>, vector<16x64xf32> -> vector<16x64xf32>
    %7 = arith.addf %3, %6 : vector<16x64xf32>
    %c0_6 = arith.constant 0 : index
    %c0_7 = arith.constant 0 : index
    %8 = vector.load %arg7[%c0_6, %c0_7] : memref<16x64xf32, #tpu.memory_space<vmem>>, vector<16x64xf32>
    tpu.vector_store %arg7[%c0_6, %c0_7], %7 {strides = array<i32>} : memref<16x64xf32, #tpu.memory_space<vmem>>, vector<16x64xf32>,
    %c0_i32_8 = arith.constant 0 : i32
    %9 = arith.cmpi eq, %arg2, %c0_i32_8 : i32
    %10 = arith.extui %9 : i1 to i32
    %c0_i32_9 = arith.constant 0 : i32
    %11 = arith.cmpi ne, %10, %c0_i32_9 : i32
    scf.if %11 {
      %c0_10 = arith.constant 0 : index
      %c0_11 = arith.constant 0 : index
      %12 = vector.load %arg7[%c0_10, %c0_11] : memref<16x64xf32, #tpu.memory_space<vmem>>, vector<16x64xf32>
      %c0_12 = arith.constant 0 : index
      %c0_13 = arith.constant 0 : index
      %13 = vector.load %arg5[%c0_12, %c0_13] : memref<1x64xf32, #tpu.memory_space<vmem>>, vector<1x64xf32>
      %14 = vector.broadcast %13 : vector<1x64xf32> to vector<16x64xf32>
      %15 = arith.addf %12, %14 : vector<16x64xf32>
      %cst_14 = arith.constant 5.000000e-01 : f32
      %16 = vector.broadcast %cst_14 : f32 to vector<16x64xf32>
      %17 = arith.mulf %16, %15 : vector<16x64xf32>
      %cst_15 = arith.constant 4.471500e-02 : f32
      %18 = vector.broadcast %cst_15 : f32 to vector<16x64xf32>
      %19 = arith.mulf %18, %15 : vector<16x64xf32>
      %20 = arith.mulf %19, %15 : vector<16x64xf32>
      %21 = arith.mulf %20, %15 : vector<16x64xf32>
      %22 = arith.addf %15, %21 : vector<16x64xf32>
      %cst_16 = arith.constant 0.797884583 : f32
      %23 = vector.broadcast %cst_16 : f32 to vector<16x64xf32>
      %24 = arith.mulf %23, %22 : vector<16x64xf32>
      %25 = math.tanh %24 : vector<16x64xf32>
      %cst_17 = arith.constant 1.000000e+00 : f32
      %26 = vector.broadcast %cst_17 : f32 to vector<16x64xf32>
      %27 = arith.addf %26, %25 : vector<16x64xf32>
      %28 = arith.mulf %17, %27 : vector<16x64xf32>
      %29 = arith.truncf %28 : vector<16x64xf32> to vector<16x64xbf16>
      %c0_18 = arith.constant 0 : index
      %c0_19 = arith.constant 0 : index
      %30 = vector.load %arg6[%c0_18, %c0_19] : memref<16x64xbf16, #tpu.memory_space<vmem>>, vector<16x64xbf16>
      tpu.vector_store %arg6[%c0_18, %c0_19], %29 {strides = array<i32>} : memref<16x64xbf16, #tpu.memory_space<vmem>>, vector<16x64xbf16>,
    } else {
    }
    return
  }
  func.func @transform_0(%arg0: i32, %arg1: i32, %arg2: i32) -> (i32, i32) {
    %c0_i32 = arith.constant 0 : i32
    return %arg0, %arg2 : i32, i32
  }
  func.func @transform_1(%arg0: i32, %arg1: i32, %arg2: i32) -> (i32, i32) {
    %c0_i32 = arith.constant 0 : i32
    return %arg2, %arg1 : i32, i32
  }
  func.func @transform_2(%arg0: i32, %arg1: i32, %arg2: i32) -> (i32, i32) {
    %c0_i32 = arith.constant 0 : i32
    %c0_i32_0 = arith.constant 0 : i32
    return %c0_i32, %arg1 : i32, i32
  }
  func.func @transform_3(%arg0: i32, %arg1: i32, %arg2: i32) -> (i32, i32) {
    %c0_i32 = arith.constant 0 : i32
    return %arg0, %arg1 : i32, i32
  }
}

module attributes {stable_mosaic.version = 11 : i64} {
  func.func @_linear_kernel(%arg0: i32, %arg1: i32, %arg2: i32, %arg3: memref<16x64xbf16, #tpu.memory_space<vmem>>, %arg4: memref<64x32xbf16, #tpu.memory_space<vmem>>, %arg5: memref<1x32xf32, #tpu.memory_space<vmem>>, %arg6: memref<16x32xbf16, #tpu.memory_space<vmem>>, %arg7: memref<16x32xf32, #tpu.memory_space<vmem>>) attributes {dimension_semantics = [#tpu.dimension_semantics<parallel>, #tpu.dimension_semantics<parallel>, #tpu.dimension_semantics<arbitrary>], iteration_bounds = array<i64: 1, 1, 1>, scalar_prefetch = 0 : i64, scratch_operands = 1 : i64, tpu.core_type = #tpu.core_type<tc>, window_params = [{transform_indices = @transform_0, window_bounds = array<i64: 16, 64>}, {transform_indices = @transform_1, window_bounds = array<i64: 64, 32>}, {transform_indices = @transform_2, window_bounds = array<i64: 1, 32>}, {transform_indices = @transform_3, window_bounds = array<i64: 16, 32>}]} {
    %c0_i32 = arith.constant 0 : i32
    %0 = arith.cmpi eq, %arg2, %c0_i32 : i32
    %1 = arith.extui %0 : i1 to i32
    %c0_i32_0 = arith.constant 0 : i32
    %2 = arith.cmpi ne, %1, %c0_i32_0 : i32
    scf.if %2 {
      %cst_10 = arith.constant 0.000000e+00 : f32
      %12 = vector.broadcast %cst_10 : f32 to vector<16x32xf32>
      %c0_11 = arith.constant 0 : index
      %c0_12 = arith.constant 0 : index
      %13 = vector.load %arg7[%c0_11, %c0_12] : memref<16x32xf32, #tpu.memory_space<vmem>>, vector<16x32xf32>
      tpu.vector_store %arg7[%c0_11, %c0_12], %12 {strides = array<i32>} : memref<16x32xf32, #tpu.memory_space<vmem>>, vector<16x32xf32>,
    } else {
    }
    %c0 = arith.constant 0 : index
    %c0_1 = arith.constant 0 : index
    %3 = vector.load %arg7[%c0, %c0_1] : memref<16x32xf32, #tpu.memory_space<vmem>>, vector<16x32xf32>
    %c0_2 = arith.constant 0 : index
    %c0_3 = arith.constant 0 : index
    %4 = vector.load %arg3[%c0_2, %c0_3] : memref<16x64xbf16, #tpu.memory_space<vmem>>, vector<16x64xbf16>
    %c0_4 = arith.constant 0 : index
    %c0_5 = arith.constant 0 : index
    %5 = vector.load %arg4[%c0_4, %c0_5] : memref<64x32xbf16, #tpu.memory_space<vmem>>, vector<64x32xbf16>
    %cst = arith.constant dense<0.000000e+00> : vector<16x32xf32>
    %6 = tpu.matmul %4, %5, %cst {dimension_numbers = #tpu.dot_dimension_numbers<[1], [0], [0], [1], [0, 0, 1, 1], [], []>} : vector<16x64xbf16>, vector<64x32xbf16>, vector<16x32xf32> -> vector<16x32xf32>
    %7 = arith.addf %3, %6 : vector<16x32xf32>
    %c0_6 = arith.constant 0 : index
    %c0_7 = arith.constant 0 : index
    %8 = vector.load %arg7[%c0_6, %c0_7] : memref<16x32xf32, #tpu.memory_space<vmem>>, vector<16x32xf32>
    tpu.vector_store %arg7[%c0_6, %c0_7], %7 {strides = array<i32>} : memref<16x32xf32, #tpu.memory_space<vmem>>, vector<16x32xf32>,
    %c0_i32_8 = arith.constant 0 : i32
    %9 = arith.cmpi eq, %arg2, %c0_i32_8 : i32
    %10 = arith.extui %9 : i1 to i32
    %c0_i32_9 = arith.constant 0 : i32
    %11 = arith.cmpi ne, %10, %c0_i32_9 : i32
    scf.if %11 {
      %c0_10 = arith.constant 0 : index
      %c0_11 = arith.constant 0 : index
      %12 = vector.load %arg7[%c0_10, %c0_11] : memref<16x32xf32, #tpu.memory_space<vmem>>, vector<16x32xf32>
      %c0_12 = arith.constant 0 : index
      %c0_13 = arith.constant 0 : index
      %13 = vector.load %arg5[%c0_12, %c0_13] : memref<1x32xf32, #tpu.memory_space<vmem>>, vector<1x32xf32>
      %14 = vector.broadcast %13 : vector<1x32xf32> to vector<16x32xf32>
      %15 = arith.addf %12, %14 : vector<16x32xf32>
      %16 = arith.truncf %15 : vector<16x32xf32> to vector<16x32xbf16>
      %c0_14 = arith.constant 0 : index
      %c0_15 = arith.constant 0 : index
      %17 = vector.load %arg6[%c0_14, %c0_15] : memref<16x32xbf16, #tpu.memory_space<vmem>>, vector<16x32xbf16>
      tpu.vector_store %arg6[%c0_14, %c0_15], %16 {strides = array<i32>} : memref<16x32xbf16, #tpu.memory_space<vmem>>, vector<16x32xbf16>,
    } else {
    }
    return
  }
  func.func @transform_0(%arg0: i32, %arg1: i32, %arg2: i32) -> (i32, i32) {
    %c0_i32 = arith.constant 0 : i32
    return %arg0, %arg2 : i32, i32
  }
  func.func @transform_1(%arg0: i32, %arg1: i32, %arg2: i32) -> (i32, i32) {
    %c0_i32 = arith.constant 0 : i32
    return %arg2, %arg1 : i32, i32
  }
  func.func @transform_2(%arg0: i32, %arg1: i32, %arg2: i32) -> (i32, i32) {
    %c0_i32 = arith.constant 0 : i32
    %c0_i32_0 = arith.constant 0 : i32
    return %c0_i32, %arg1 : i32, i32
  }
  func.func @transform_3(%arg0: i32, %arg1: i32, %arg2: i32) -> (i32, i32) {
    %c0_i32 = arith.constant 0 : i32
    return %arg0, %arg1 : i32, i32
  }
}

</mosaic_0001>

<bundles_post_ra>
// kernel: bert_forward.11
= control target key start
LH: loop header
LB: loop body
LE: loop exit
PB: predicated region body
PF: predicated region fallthrough
CT: control target
= control target key end

     0   :  { %vm18_vm0 = vcmask 261120   ;;  %vm70_vm1 = vcmask 257024   ;;  %s129_s0 = inlined_call_operand.vmem [shape: f32[16,32], index: 0, kind: input, shape index: {}]   ;;  %s130_s1 = inlined_call_operand.vmem [shape: f32[1,32], index: 1, kind: input, shape index: {}]   ;;  %s131_s2 = inlined_call_operand.vmem [shape: f32[1,32], index: 2, kind: input, shape index: {}]   ;;  %s132_s3 = inlined_call_operand.vmem [shape: bf16[16,32], index: 3, kind: output, shape index: {}]  }
   0x1   :  { %v14_v0 = vld [vmem:[%s129_s0] sm:$0xff]  ;;  %v15_v1 = vld [vmem:[%s129_s0 + $0x8] sm:$0xff] }
   0x2   :  { %v19_v2 = vsel %vm18_vm0, %v14_v0, 0.0  ;;  %v22_v3 = vsel %vm18_vm0, %v15_v1, 0.0  ;;  %v77_v21 = vld [vmem:[%s130_s1] ss:$0 sm:$0xff] }
   0x3   :  { %20 = vadd.xlane.f32.xlu0 %v19_v2  ;;  %v78_v23 = vld [vmem:[%s131_s2] ss:$0 sm:$0xff] }
   0x7   :  { %23 = vadd.xlane.f32.xlu0 %v22_v3 }
  0x90   :  { %v21_v4 = vpop.xlane.xlu0 %20 }
  0x91   :  { %v26_v5 = vmul.f32 0.03125, %v21_v4 }
  0x93   :  { %v28_v6 = vsub.f32 %v14_v0, %v26_v5 }
  0x94   :  { %v24_v7 = vpop.xlane.xlu0 %23 }
  0x95   :  { %v27_v8 = vmul.f32 0.03125, %v24_v7  ;;  %v30_v9 = vmul.f32 %v28_v6, %v28_v6 }
  0x97   :  { %v29_v10 = vsub.f32 %v15_v1, %v27_v8  ;;  %v32_v11 = vsel %vm18_vm0, %v30_v9, 0.0 }
  0x98   :  { %33 = vadd.xlane.f32.xlu1 %v32_v11 }
  0x99   :  { %v31_v12 = vmul.f32 %v29_v10, %v29_v10 }
  0x9b   :  { %v35_v13 = vsel %vm18_vm0, %v31_v12, 0.0 }
  0x9c   :  { %36 = vadd.xlane.f32.xlu1 %v35_v13 }
 0x125   :  { %v34_v14 = vpop.xlane.xlu1 %33 }
 0x126   :  { %v38_v15 = vmul.f32 0.03125, %v34_v14 }
 0x128   :  { %v40_v16 = vadd.f32 1e-05, %v38_v15 }
 0x129   :  { %v37_v17 = vpop.xlane.xlu1 %36 }
 0x12a   :  { %83 = vrsqrt.f32 %v40_v16  ;;  %v39_v18 = vmul.f32 0.03125, %v37_v17 }
 0x12c   :  { %v41_v19 = vadd.f32 1e-05, %v39_v18 }
 0x12e   :  { %85 = vrsqrt.f32 %v41_v19 }
 0x134   :  { %v84_v20 = vpop.eup %83 }
 0x135   :  { %v44_v22 = vmul.f32 %v84_v20, %v28_v6 }
 0x137   :  { %v52_v24 = vmul.f32 %v77_v21, %v44_v22 }
 0x138   :  { %v86_v25 = vpop.eup %85 }
 0x139   :  { %v60_v26 = vadd.f32 %v78_v23, %v52_v24  ;;  %v45_v27 = vmul.f32 %v86_v25, %v29_v10 }
 0x13b   :  { %v81_v28 = vpack.c.bf16 %v60_v26, %v60_v26  ;;  %v53_v29 = vmul.f32 %v77_v21, %v45_v27 }
 0x13d   :  { %71 = vst.msk [vmem:[%s132_s3] sm:$0xf] %vm70_vm1, %v81_v28  ;;  %v61_v30 = vadd.f32 %v78_v23, %v53_v29 }
 0x13f   :  { %v82_v31 = vpack.c.bf16 %v61_v30, %v61_v30 }
 0x141   :  { %72 = vst.msk [vmem:[%s132_s3 + $0x4] sm:$0xf] %vm70_vm1, %v82_v31 }

// kernel: bert_forward.12
= control target key start
LH: loop header
LB: loop body
LE: loop exit
PB: predicated region body
PF: predicated region fallthrough
CT: control target
= control target key end

     0   :  { %vm19_vm0 = vcmask 785408   ;;  %v151_v0 = vmov 0.0   ;;  %vm152_vm1 = vmmov 0   ;;  %vm47_vm2 = vcmask 261120   ;;  %s195_s1 = inlined_call_operand.vmem [shape: bf16[32,96], index: 1, kind: input, shape index: {}]   ;;  %s196_s0 = inlined_call_operand.vmem [shape: bf16[16,32], index: 0, kind: input, shape index: {}]   ;;  %s197_s2 = inlined_call_operand.vmem [shape: f32[1,96], index: 2, kind: input, shape index: {}]   ;;  %s198_s3 = inlined_call_operand.vmem [shape: bf16[16,96], index: 3, kind: output, shape index: {}]  }
   0x1   :  { %138 = vmatprep.subr.bf16.mxu0 %v151_v0  ;;  %v148_v1 = vld [vmem:[%s195_s1] sm:$0xff]   ;;  %142 = vmatprep.mubr.msk.bf16.mxu0 %vm152_vm1, %v151_v0  ;;  %20 = vst.msk [vmem:[#allocation2] sm:$0xff] %vm19_vm0, %v151_v0  ;;  %21 = vst.msk [vmem:[#allocation2 + $0x8] sm:$0xff] %vm19_vm0, %v151_v0  ;;  %v149_v2 = vld [vmem:[%s195_s1 + $0x8] sm:$0xff]   ;;  %vm119_vm3 = vcmask 781312  }
   0x2   :  { %139 = vmatpush3.bf16.msra.mxu0 %v148_v1  ;;  %v150_v3 = vld [vmem:[%s196_s0] sm:$0xff]  }
   0x3   :  { %140 = vmatprep.subr.bf16.mxu0 %v151_v0  ;;  %v130_v12 = vld [vmem:[%s197_s2] ss:$0 sm:$0xff] }
   0x6   :  { %141 = vmatpush3.bf16.msra.mxu0 %v149_v2 }
   0x8   :  { %v22_v4 = vld [vmem:[#allocation2] sm:$0xff]  ;;  %v23_v6 = vld [vmem:[#allocation2 + $0x8] sm:$0xff] }
   0x9   :  { %143 = vmatmul.mubr.msk.bf16.vlgmr.msra.gmra.mrb[0].mxu0 %vm47_vm2, %v150_v3 }
  0xdc   :  { %v85_v5 = vpop.f32.mrb[0].mxu0 }
  0xdd   :  { %v92_v7 = vadd.f32 %v85_v5, %v22_v4  ;;  %v144_v8 = vpop.f32.mrb[1].mxu0 }
  0xde   :  { %v88_v9 = vpop.f32.mrb[2].mxu0 }
  0xdf   :  { %95 = vst.msk [vmem:[#allocation2] sm:$0xff] %vm19_vm0, %v92_v7  ;;  %v93_v10 = vadd.f32 %v88_v9, %v23_v6  ;;  %v145_v11 = vpop.f32.mrb[3].mxu0 }
  0xe1   :  { %96 = vst.msk [vmem:[#allocation2 + $0x8] sm:$0xff] %vm19_vm0, %v93_v10 }
  0xe6   :  { %v100_v13 = vld [vmem:[#allocation2] sm:$0xff] }
  0xe7   :  { %v109_v14 = vadd.f32 %v130_v12, %v100_v13 }
  0xe8   :  { %v101_v15 = vld [vmem:[#allocation2 + $0x8] sm:$0xff] }
  0xe9   :  { %v133_v16 = vpack.c.bf16 %v109_v14, %v109_v14  ;;  %v110_v17 = vadd.f32 %v130_v12, %v101_v15 }
  0xeb   :  { %120 = vst.msk [vmem:[%s198_s3] sm:$0xf] %vm119_vm3, %v133_v16  ;;  %v134_v18 = vpack.c.bf16 %v110_v17, %v110_v17 }
  0xed   :  { %121 = vst.msk [vmem:[%s198_s3 + $0x4] sm:$0xf] %vm119_vm3, %v134_v18 }

// kernel: bert_forward.13
= control target key start
LH: loop header
LB: loop body
LE: loop exit
PB: predicated region body
PF: predicated region fallthrough
CT: control target
= control target key end

     0   :  { %s657_s9 = smov 0   ;;  %s659_s10 = smov 0   ;;  %s727_s0 = inlined_call_operand.vmem [shape: bf16[2,8,96], index: 0, kind: input, shape index: {}]   ;;  %s728_s1 = inlined_call_operand.vmem [shape: f32[2,1,8], index: 1, kind: input, shape index: {}]   ;;  %s729_s2 = inlined_call_operand.vmem [shape: bf16[2,8,32], index: 2, kind: output, shape index: {}]  }
   0x1   :  { %s661_s11 = smov 0  }
   0x2 LB: > { %s24_s12 = sadd.s32 1, %s628_s10  ;;  %p521_p0 = scmp.ge.s32.totalorder %s632_s11, 1  ;;  %s632_s11 = sphi %s661_s11, %s12_s11   ;;  %s628_s10 = sphi %s659_s10, %s731_s10   ;;  %s624_s9 = sphi %s657_s9, %s730_s9  }
   0x3   : > { %p26_p1 = scmp.ge.s32.totalorder %s24_s12, 2  ;;  %p133_p2 = scmp.lt.s32.totalorder %s632_s11, 3 }
   0x5   : > { %s733_s12 = smov (%p26_p1, %s24_s12), 0  ;;  %p134_p3 = pnand %p521_p0, %p133_p2 }
   0x6   : > { %p159_p4 = scmp.lt.s32.totalorder (!%p134_p3), %s624_s9, 1  ;;  %v634_v0 = vmov (!%p134_p3), 0.0   ;;  %vm635_vm0 = vmmov (!%p134_p3), 0   ;;  %s636_s17 = smov (!%p134_p3), 96   ;;  %vm195_vm1 = vcmask (!%p134_p3), 130048   ;;  %vm242_vm2 = vcmask (!%p134_p3), 64512  }
   0x7   : > { %137 = sbr.rel (%p134_p3) target bundleno = 1539 (0x603), region = 28  ;;  %544 = vmatprep.subr.bf16.mxu0 (!%p134_p3), %v634_v0  ;;  %546 = vmatprep.mubr.msk.bf16.mxu0 (!%p134_p3), %vm635_vm0, %v634_v0  ;;  %s637_s18 = smov (!%p134_p3), 64   ;;  %vm260_vm3 = vcmask (!%p134_p3), 1043456   ;;  %vm305_vm4 = vcmask (!%p134_p3), 125952   ;;  %vm433_vm5 = vcmask (!%p134_p3), 257152  }
   0x8   : > { %550 = vmatprep.subr.bf16.mxu1 (!%p134_p3), %v634_v0  ;;  %552 = vmatprep.mubr.msk.bf16.mxu1 (!%p134_p3), %vm635_vm0, %v634_v0  ;;  %s638_s22 = smov (!%p134_p3), 80   ;;  %s639_s23 = smov (!%p134_p3), 112  }
   0x9   : > { %s640_s27 = smov (!%p134_p3), 48   ;;  %s641_s28 = smov (!%p134_p3), 16  }
   0xe   : > { %s735_s9 = smov (!%p159_p4, %s624_s9), 1 }
   0xf   : > { %s522_s13 = sshll.u32 %s735_s9, 2  ;;  %s165_s21 = scalar_lea.vmem %s728_s1, %s735_s9 }
  0x10   : > { %s685_s16 = scalar_lea.vmem %s727_s0, %s522_s13  ;;  %v524_v6 = vld [vmem:[%s165_s21] ss:$0 sm:$0xff]  ;;  %s710_s26 = scalar_lea.vmem %s729_s2, %s522_s13 }
  0x11   : > { %v600_v1 = vld [vmem:[%s685_s16] ss:$0 sps:$4 sm:$0xff]  }
  0x12   : > { %193 = vrot.lane.b32.xlu0 %v600_v1, %s636_s17  ;;  %v181_v4 = vld [vmem:[%s685_s16] sm:$0xf]  ;;  %255 = vrot.lane.b32.xlu1 %v600_v1, %s637_s18 }
  0x13   : > { %v182_v5 = vmul.bf16 1048592000, %v181_v4  ;;  %v307_v20 = vld [vmem:[%s685_s16] sm:$0xf] }
  0x14   : > { %v601_v21 = vld [vmem:[%s685_s16] ss:$0 sps:$4 sm:$0xff]   ;;  %v308_v22 = vmul.bf16 1048592000, %v307_v20 }
  0x16   : > { %v528_v23 = vcombine.low %v308_v22, %v308_v22 }
  0x84   : > { %v194_v2 = vpop.permute.xlu0 %193  ;;  %v256_v13 = vpop.permute.xlu1 %255 }
  0x85   : > { %v200_v3 = vsel %vm195_vm1, %v194_v2, 0  ;;  %v262_v14 = vsel %vm260_vm3, %v256_v13, 0 }
  0x86   : > { %545 = vmatpush3.bf16.xpose.msra.mxu0 %v200_v3  ;;  %551 = vmatpush3.bf16.msra.mxu1 %v262_v14 }
  0x87   : > { %562 = vmatprep.subr.bf16.mxu0 %v634_v0  ;;  %556 = vmatprep.subr.bf16.mxu1 %v634_v0 }
  0x8d   : > { %547 = vmatmul.mubr.msk.bf16.vlgmr.msra.gmra.mrb[0].mxu0 %vm195_vm1, %v182_v5 }
  0x8e   : > { %564 = vmatprep.mubr.msk.bf16.mxu0 %vm635_vm0, %v634_v0 }
 0x160   : > { %v236_v7 = vpop.f32.mrb[0].mxu0 }
 0x161   : > { %v237_v8 = vadd.f32 %v524_v6, %v236_v7  ;;  %v548_v9 = vpop.f32.mrb[1].mxu0 }
 0x162   : > { %v239_v10 = vpop.f32.mrb[2].mxu0 }
 0x163   : > { %v549_v11 = vpop.f32.mrb[3].mxu0  ;;  %v243_v12 = vsel %vm242_vm2, %v237_v8, -inf }
 0x164   : > { %244 = vmax.xlane.f32.xlu0 %v243_v12 }
 0x1f1   : > { %v245_v15 = vpop.xlane.xlu0 %244 }
 0x1f2   : > { %v246_v16 = vsub.f32 %v237_v8, %v245_v15 }
 0x1f4   : > { %v247_v17 = vmul.f32 1.442695, %v246_v16 }
 0x1f6   : > { %602 = vpow2.f32 %v247_v17 }
 0x200   : > { %v603_v18 = vpop.eup %602 }
 0x201   : > { %v249_v19 = vsel %vm242_vm2, %v603_v18, 0.0 }
 0x202   : > { %250 = vadd.xlane.f32.xlu1 %v249_v19 }
 0x213   : > { %318 = vrot.lane.b32.xlu1 %v601_v21, %s638_s22 }
 0x217   : > { %313 = vrot.lane.b32.xlu1 %v528_v23, %s639_s23 }
 0x28f   : > { %v251_v24 = vpop.xlane.xlu1 %250 }
 0x290   : > { %604 = vrcp.f32 %v251_v24 }
 0x293   : > { %v319_v26 = vpop.permute.xlu1 %318 }
 0x294   : > { %v324_v28 = vsel %vm195_vm1, %v319_v26, 0 }
 0x297   : > { %v314_v30 = vpop.permute.xlu1 %313 }
 0x29a   : > { %v605_v25 = vpop.eup %604 }
 0x29b   : > { %v253_v27 = vmul.f32 %v605_v25, %v603_v18 }
 0x29d   : > { %v254_v29 = vpack.c.bf16 %v253_v27, %v253_v27 }
 0x29f   : > { %553 = vmatmul.mubr.msk.bf16.vlgmr.msra.gmra.mrb[0].mxu1 %vm242_vm2, %v254_v29 }
 0x2a0   : > { %557 = vmatpush3.bf16.xpose.msra.mxu1 %v324_v28  ;;  %558 = vmatprep.mubr.msk.bf16.mxu1 %vm635_vm0, %v634_v0 }
 0x2a7   : > { %559 = vmatmul.mubr.msk.bf16.vlgmr.msra.gmra.mrb[4].mxu1 %vm195_vm1, %v314_v30 }
 0x372   : > { %v298_v31 = vpop.f32.mrb[0].mxu1 }
 0x373   : > { %v304_v32 = vpack.c.bf16 %v298_v31, %v298_v31  ;;  %v554_v33 = vpop.f32.mrb[1].mxu1 }
 0x374   : > { %v301_v34 = vpop.f32.mrb[2].mxu1 }
 0x375   : > { %306 = vst.msk [vmem:[%s710_s26] sm:$0xf] %vm305_vm4, %v304_v32  ;;  %v555_v35 = vpop.f32.mrb[3].mxu1 }
 0x37a   : > { %v360_v36 = vpop.f32.mrb[4].mxu1 }
 0x37b   : > { %v361_v37 = vadd.f32 %v524_v6, %v360_v36  ;;  %v560_v38 = vpop.f32.mrb[5].mxu1 }
 0x37c   : > { %v363_v39 = vpop.f32.mrb[6].mxu1 }
 0x37d   : > { %v561_v40 = vpop.f32.mrb[7].mxu1  ;;  %v366_v41 = vsel %vm242_vm2, %v361_v37, -inf }
 0x37e   : > { %367 = vmax.xlane.f32.xlu1 %v366_v41 }
 0x40b   : > { %v368_v42 = vpop.xlane.xlu1 %367 }
 0x40c   : > { %v369_v43 = vsub.f32 %v361_v37, %v368_v42 }
 0x40e   : > { %v370_v44 = vmul.f32 1.442695, %v369_v43 }
 0x410   : > { %606 = vpow2.f32 %v370_v44 }
 0x41a   : > { %v607_v45 = vpop.eup %606 }
 0x41b   : > { %v372_v46 = vsel %vm242_vm2, %v607_v45, 0.0 }
 0x41c   : > { %373 = vadd.xlane.f32.xlu0 %v372_v46 }
 0x432   : > { %378 = vrot.lane.b32.xlu0 %v601_v21, %s640_s27 }
 0x4a9   : > { %v374_v47 = vpop.xlane.xlu0 %373 }
 0x4aa   : > { %608 = vrcp.f32 %v374_v47 }
 0x4ad   : > { %v379_v48 = vpop.permute.xlu0 %378 }
 0x4ae   : > { %v384_v49 = vsel %vm260_vm3, %v379_v48, 0 }
 0x4af   : > { %563 = vmatpush3.bf16.msra.mxu0 %v384_v49 }
 0x4b4   : > { %v609_v50 = vpop.eup %608 }
 0x4b5   : > { %v376_v51 = vmul.f32 %v609_v50, %v607_v45 }
 0x4b7   : > { %v377_v52 = vpack.c.bf16 %v376_v51, %v376_v51 }
 0x4b9   : > { %565 = vmatmul.mubr.msk.bf16.vlgmr.msra.gmra.mrb[4].mxu0 %vm242_vm2, %v377_v52 }
 0x58c   : > { %v420_v53 = vpop.f32.mrb[4].mxu0 }
 0x58d   : > { %v535_v54 = vpack.c.bf16 %v420_v53, %v420_v53  ;;  %v566_v55 = vpop.f32.mrb[5].mxu0 }
 0x58e   : > { %v423_v56 = vpop.f32.mrb[6].mxu0 }
 0x58f   : > { %430 = vrot.lane.b32.xlu0 %v535_v54, %s641_s28  ;;  %v567_v57 = vpop.f32.mrb[7].mxu0 }
 0x601   : > { %v431_v58 = vpop.permute.xlu0 %430 }
 0x602   : > { %434 = vst.msk [vmem:[%s710_s26] sm:$0xf] %vm433_vm5, %v431_v58 }
 0x603 PF: > { %s12_s11 = sadd.s32 1, %s632_s11   ;;  %s730_s9 = smov %s628_s10 }
 0x604   : > { %p9_p5 = scmp.ge.s32.totalorder %s12_s11, 4   ;;  %s731_s10 = smov %s733_s12 }
 0x606   :  { %11 = sbr.rel (!%p9_p5) target bundleno = 2 (0x2), region = 62 }

// kernel: bert_forward.14
= control target key start
LH: loop header
LB: loop body
LE: loop exit
PB: predicated region body
PF: predicated region fallthrough
CT: control target
= control target key end

     0   :  { %vm28_vm0 = vcmask 261120   ;;  %v220_v0 = vmov 0.0   ;;  %vm221_vm1 = vmmov 0   ;;  %vm178_vm2 = vcmask 257024   ;;  %s293_s1 = inlined_call_operand.vmem [shape: bf16[32,32], index: 1, kind: input, shape index: {}]   ;;  %s294_s0 = inlined_call_operand.vmem [shape: bf16[16,32], index: 0, kind: input, shape index: {}]   ;;  %s295_s3 = inlined_call_operand.vmem [shape: bf16[16,32], index: 3, kind: input, shape index: {}]   ;;  %s296_s2 = inlined_call_operand.vmem [shape: f32[1,32], index: 2, kind: input, shape index: {}]   ;;  %s297_s4 = inlined_call_operand.vmem [shape: f32[1,32], index: 4, kind: input, shape index: {}]   ;;  %s298_s5 = inlined_call_operand.vmem [shape: f32[1,32], index: 5, kind: input, shape index: {}]   ;;  %s299_s6 = inlined_call_operand.vmem [shape: bf16[16,32], index: 6, kind: output, shape index: {}]  }
   0x1   :  { %203 = vmatprep.subr.bf16.mxu0 %v220_v0  ;;  %v213_v1 = vld [vmem:[%s293_s1] sm:$0xff]   ;;  %207 = vmatprep.mubr.msk.bf16.mxu0 %vm221_vm1, %v220_v0  ;;  %29 = vst.msk [vmem:[#allocation2] sm:$0xff] %vm28_vm0, %v220_v0  ;;  %30 = vst.msk [vmem:[#allocation2 + $0x8] sm:$0xff] %vm28_vm0, %v220_v0  ;;  %v214_v2 = vld [vmem:[%s293_s1 + $0x8] sm:$0xff]  }
   0x2   :  { %204 = vmatpush3.bf16.msra.mxu0 %v213_v1  ;;  %v215_v3 = vld [vmem:[%s294_s0] sm:$0xff]  }
   0x3   :  { %205 = vmatprep.subr.bf16.mxu0 %v220_v0  ;;  %v197_v12 = vld [vmem:[%s295_s3] sm:$0xff]  }
   0x4   :  { %v189_v13 = vld [vmem:[%s296_s2] ss:$0 sm:$0xff]  ;;  %v198_v14 = vunpack.c.l.bf16 %v197_v12  ;;  %v199_v17 = vunpack.c.h.bf16 %v197_v12 }
   0x5   :  { %v190_v41 = vld [vmem:[%s297_s4] ss:$0 sm:$0xff] }
   0x6   :  { %206 = vmatpush3.bf16.msra.mxu0 %v214_v2  ;;  %v191_v43 = vld [vmem:[%s298_s5] ss:$0 sm:$0xff] }
   0x8   :  { %v31_v4 = vld [vmem:[#allocation2] sm:$0xff]  ;;  %v32_v6 = vld [vmem:[#allocation2 + $0x8] sm:$0xff] }
   0x9   :  { %208 = vmatmul.mubr.msk.bf16.vlgmr.msra.gmra.mrb[0].mxu0 %vm28_vm0, %v215_v3 }
  0xdc   :  { %v94_v5 = vpop.f32.mrb[0].mxu0 }
  0xdd   :  { %v101_v7 = vadd.f32 %v94_v5, %v31_v4  ;;  %v209_v8 = vpop.f32.mrb[1].mxu0 }
  0xde   :  { %v97_v9 = vpop.f32.mrb[2].mxu0 }
  0xdf   :  { %103 = vst.msk [vmem:[#allocation2] sm:$0xff] %vm28_vm0, %v101_v7  ;;  %v102_v10 = vadd.f32 %v97_v9, %v32_v6  ;;  %v210_v11 = vpop.f32.mrb[3].mxu0 }
  0xe1   :  { %104 = vst.msk [vmem:[#allocation2 + $0x8] sm:$0xff] %vm28_vm0, %v102_v10 }
  0xe6   :  { %v108_v15 = vld [vmem:[#allocation2] sm:$0xff] }
  0xe7   :  { %v117_v16 = vadd.f32 %v189_v13, %v108_v15 }
  0xe8   :  { %v109_v18 = vld [vmem:[#allocation2 + $0x8] sm:$0xff] }
  0xe9   :  { %v123_v19 = vadd.f32 %v198_v14, %v117_v16  ;;  %v118_v20 = vadd.f32 %v189_v13, %v109_v18 }
  0xeb   :  { %v127_v21 = vsel %vm28_vm0, %v123_v19, 0.0  ;;  %v124_v22 = vadd.f32 %v199_v17, %v118_v20 }
  0xec   :  { %128 = vadd.xlane.f32.xlu0 %v127_v21 }
  0xed   :  { %v130_v23 = vsel %vm28_vm0, %v124_v22, 0.0 }
  0xf0   :  { %131 = vadd.xlane.f32.xlu0 %v130_v23 }
 0x179   :  { %v129_v24 = vpop.xlane.xlu0 %128 }
 0x17a   :  { %v134_v25 = vmul.f32 0.03125, %v129_v24 }
 0x17c   :  { %v136_v26 = vsub.f32 %v123_v19, %v134_v25 }
 0x17d   :  { %v132_v27 = vpop.xlane.xlu0 %131 }
 0x17e   :  { %v135_v28 = vmul.f32 0.03125, %v132_v27  ;;  %v138_v29 = vmul.f32 %v136_v26, %v136_v26 }
 0x180   :  { %v137_v30 = vsub.f32 %v124_v22, %v135_v28  ;;  %v140_v31 = vsel %vm28_vm0, %v138_v29, 0.0 }
 0x181   :  { %141 = vadd.xlane.f32.xlu1 %v140_v31 }
 0x182   :  { %v139_v32 = vmul.f32 %v137_v30, %v137_v30 }
 0x184   :  { %v143_v33 = vsel %vm28_vm0, %v139_v32, 0.0 }
 0x185   :  { %144 = vadd.xlane.f32.xlu1 %v143_v33 }
 0x20e   :  { %v142_v34 = vpop.xlane.xlu1 %141 }
 0x20f   :  { %v146_v35 = vmul.f32 0.03125, %v142_v34 }
 0x211   :  { %v148_v36 = vadd.f32 1e-05, %v146_v35 }
 0x212   :  { %v145_v37 = vpop.xlane.xlu1 %144 }
 0x213   :  { %216 = vrsqrt.f32 %v148_v36  ;;  %v147_v38 = vmul.f32 0.03125, %v145_v37 }
 0x215   :  { %v149_v39 = vadd.f32 1e-05, %v147_v38 }
 0x217   :  { %218 = vrsqrt.f32 %v149_v39 }
 0x21d   :  { %v217_v40 = vpop.eup %216 }
 0x21e   :  { %v152_v42 = vmul.f32 %v217_v40, %v136_v26 }
 0x220   :  { %v160_v44 = vmul.f32 %v190_v41, %v152_v42 }
 0x221   :  { %v219_v45 = vpop.eup %218 }
 0x222   :  { %v168_v46 = vadd.f32 %v191_v43, %v160_v44  ;;  %v153_v47 = vmul.f32 %v219_v45, %v137_v30 }
 0x224   :  { %v194_v48 = vpack.c.bf16 %v168_v46, %v168_v46  ;;  %v161_v49 = vmul.f32 %v190_v41, %v153_v47 }
 0x226   :  { %179 = vst.msk [vmem:[%s299_s6] sm:$0xf] %vm178_vm2, %v194_v48  ;;  %v169_v50 = vadd.f32 %v191_v43, %v161_v49 }
 0x228   :  { %v195_v51 = vpack.c.bf16 %v169_v50, %v169_v50 }
 0x22a   :  { %180 = vst.msk [vmem:[%s299_s6 + $0x4] sm:$0xf] %vm178_vm2, %v195_v51 }

// kernel: bert_forward.15
= control target key start
LH: loop header
LB: loop body
LE: loop exit
PB: predicated region body
PF: predicated region fallthrough
CT: control target
= control target key end

     0   :  { %vm19_vm0 = vcmask 523264   ;;  %v173_v0 = vmov 0.0   ;;  %vm174_vm1 = vmmov 0   ;;  %vm47_vm2 = vcmask 261120   ;;  %s217_s1 = inlined_call_operand.vmem [shape: bf16[32,64], index: 1, kind: input, shape index: {}]   ;;  %s218_s0 = inlined_call_operand.vmem [shape: bf16[16,32], index: 0, kind: input, shape index: {}]   ;;  %s219_s2 = inlined_call_operand.vmem [shape: f32[1,64], index: 2, kind: input, shape index: {}]   ;;  %s220_s3 = inlined_call_operand.vmem [shape: bf16[16,64], index: 3, kind: output, shape index: {}]  }
   0x1   :  { %156 = vmatprep.subr.bf16.mxu0 %v173_v0  ;;  %v166_v1 = vld [vmem:[%s217_s1] sm:$0xff]   ;;  %160 = vmatprep.mubr.msk.bf16.mxu0 %vm174_vm1, %v173_v0  ;;  %20 = vst.msk [vmem:[#allocation2] sm:$0xff] %vm19_vm0, %v173_v0  ;;  %21 = vst.msk [vmem:[#allocation2 + $0x8] sm:$0xff] %vm19_vm0, %v173_v0  ;;  %v167_v2 = vld [vmem:[%s217_s1 + $0x8] sm:$0xff]   ;;  %vm137_vm3 = vcmask 519168  }
   0x2   :  { %157 = vmatpush3.bf16.msra.mxu0 %v166_v1  ;;  %v168_v3 = vld [vmem:[%s218_s0] sm:$0xff]  }
   0x3   :  { %158 = vmatprep.subr.bf16.mxu0 %v173_v0  ;;  %v148_v12 = vld [vmem:[%s219_s2] ss:$0 sm:$0xff] }
   0x6   :  { %159 = vmatpush3.bf16.msra.mxu0 %v167_v2 }
   0x8   :  { %v22_v4 = vld [vmem:[#allocation2] sm:$0xff]  ;;  %v23_v6 = vld [vmem:[#allocation2 + $0x8] sm:$0xff] }
   0x9   :  { %161 = vmatmul.mubr.msk.bf16.vlgmr.msra.gmra.mrb[0].mxu0 %vm47_vm2, %v168_v3 }
  0xdc   :  { %v85_v5 = vpop.f32.mrb[0].mxu0 }
  0xdd   :  { %v92_v7 = vadd.f32 %v85_v5, %v22_v4  ;;  %v162_v8 = vpop.f32.mrb[1].mxu0 }
  0xde   :  { %v88_v9 = vpop.f32.mrb[2].mxu0 }
  0xdf   :  { %95 = vst.msk [vmem:[#allocation2] sm:$0xff] %vm19_vm0, %v92_v7  ;;  %v93_v10 = vadd.f32 %v88_v9, %v23_v6  ;;  %v163_v11 = vpop.f32.mrb[3].mxu0 }
  0xe1   :  { %96 = vst.msk [vmem:[#allocation2 + $0x8] sm:$0xff] %vm19_vm0, %v93_v10 }
  0xe6   :  { %v100_v13 = vld [vmem:[#allocation2] sm:$0xff] }
  0xe7   :  { %v109_v14 = vadd.f32 %v148_v12, %v100_v13 }
  0xe8   :  { %v101_v15 = vld [vmem:[#allocation2 + $0x8] sm:$0xff] }
  0xe9   :  { %v113_v16 = vmul.f32 0.044715, %v109_v14  ;;  %v110_v17 = vadd.f32 %v148_v12, %v101_v15  ;;  %v111_v28 = vmul.f32 0.5, %v109_v14 }
  0xeb   :  { %v115_v18 = vmul.f32 %v113_v16, %v109_v14  ;;  %v114_v19 = vmul.f32 0.044715, %v110_v17  ;;  %v112_v32 = vmul.f32 0.5, %v110_v17 }
  0xed   :  { %v117_v20 = vmul.f32 %v115_v18, %v109_v14  ;;  %v116_v21 = vmul.f32 %v114_v19, %v110_v17 }
  0xef   :  { %v119_v22 = vadd.f32 %v117_v20, %v109_v14  ;;  %v118_v23 = vmul.f32 %v116_v21, %v110_v17 }
  0xf1   :  { %v121_v24 = vmul.f32 0.7978846, %v119_v22  ;;  %v120_v25 = vadd.f32 %v118_v23, %v110_v17 }
  0xf3   :  { %169 = vtanh.f32 %v121_v24  ;;  %v122_v26 = vmul.f32 0.7978846, %v120_v25 }
  0xf5   :  { %171 = vtanh.f32 %v122_v26 }
  0xfd   :  { %v170_v27 = vpop.eup %169 }
  0xfe   :  { %v125_v29 = vadd.f32 1.0, %v170_v27 }
  0xff   :  { %v172_v30 = vpop.eup %171 }
 0x100   :  { %v127_v31 = vmul.f32 %v125_v29, %v111_v28  ;;  %v126_v33 = vadd.f32 1.0, %v172_v30 }
 0x102   :  { %v151_v34 = vpack.c.bf16 %v127_v31, %v127_v31  ;;  %v128_v35 = vmul.f32 %v126_v33, %v112_v32 }
 0x104   :  { %138 = vst.msk [vmem:[%s220_s3] sm:$0xf] %vm137_vm3, %v151_v34  ;;  %v152_v36 = vpack.c.bf16 %v128_v35, %v128_v35 }
 0x106   :  { %139 = vst.msk [vmem:[%s220_s3 + $0x4] sm:$0xf] %vm137_vm3, %v152_v36 }

// kernel: bert_forward.16
= control target key start
LH: loop header
LB: loop body
LE: loop exit
PB: predicated region body
PF: predicated region fallthrough
CT: control target
= control target key end

     0   :  { %vm19_vm0 = vcmask 261120   ;;  %v177_v0 = vmov 0.0   ;;  %vm178_vm1 = vmmov 0   ;;  %vm63_vm2 = vcmask 523264   ;;  %s227_s1 = inlined_call_operand.vmem [shape: bf16[64,32], index: 1, kind: input, shape index: {}]   ;;  %s228_s0 = inlined_call_operand.vmem [shape: bf16[16,64], index: 0, kind: input, shape index: {}]   ;;  %s229_s2 = inlined_call_operand.vmem [shape: f32[1,32], index: 2, kind: input, shape index: {}]   ;;  %s230_s3 = inlined_call_operand.vmem [shape: bf16[16,32], index: 3, kind: output, shape index: {}]  }
   0x1   :  { %158 = vmatprep.subr.bf16.mxu0 %v177_v0  ;;  %v172_v1 = vld [vmem:[%s227_s1] sm:$0xff]   ;;  %166 = vmatprep.mubr.msk.bf16.mxu0 %vm178_vm1, %v177_v0  ;;  %20 = vst.msk [vmem:[#allocation2] sm:$0xff] %vm19_vm0, %v177_v0  ;;  %21 = vst.msk [vmem:[#allocation2 + $0x8] sm:$0xff] %vm19_vm0, %v177_v0  ;;  %v173_v2 = vld [vmem:[%s227_s1 + $0x8] sm:$0xff]   ;;  %vm135_vm3 = vcmask 257024  }
   0x2   :  { %159 = vmatpush3.bf16.msra.mxu0 %v172_v1  ;;  %v174_v3 = vld [vmem:[%s227_s1 + $0x10] sm:$0xff]   ;;  %v175_v4 = vld [vmem:[%s227_s1 + $0x18] sm:$0xff]   ;;  %v176_v5 = vld [vmem:[%s228_s0] sm:$0xff]  }
   0x3   :  { %160 = vmatprep.subr.bf16.mxu0 %v177_v0  ;;  %v148_v14 = vld [vmem:[%s229_s2] ss:$0 sm:$0xff] }
   0x6   :  { %161 = vmatpush3.bf16.msra.mxu0 %v173_v2 }
   0x7   :  { %162 = vmatprep.subr.bf16.mxu0 %v177_v0 }
   0x8   :  { %v22_v6 = vld [vmem:[#allocation2] sm:$0xff]  ;;  %v23_v8 = vld [vmem:[#allocation2 + $0x8] sm:$0xff] }
   0xa   :  { %163 = vmatpush3.bf16.msra.mxu0 %v174_v3 }
   0xb   :  { %164 = vmatprep.subr.bf16.mxu0 %v177_v0 }
   0xe   :  { %165 = vmatpush3.bf16.msra.mxu0 %v175_v4 }
  0x11   :  { %167 = vmatmul.mubr.msk.bf16.vlgmr.msra.gmra.mrb[0].mxu0 %vm63_vm2, %v176_v5 }
  0xe4   :  { %v101_v7 = vpop.f32.mrb[0].mxu0 }
  0xe5   :  { %v108_v9 = vadd.f32 %v101_v7, %v22_v6  ;;  %v168_v10 = vpop.f32.mrb[1].mxu0 }
  0xe6   :  { %v104_v11 = vpop.f32.mrb[2].mxu0 }
  0xe7   :  { %111 = vst.msk [vmem:[#allocation2] sm:$0xff] %vm19_vm0, %v108_v9  ;;  %v109_v12 = vadd.f32 %v104_v11, %v23_v8  ;;  %v169_v13 = vpop.f32.mrb[3].mxu0 }
  0xe9   :  { %112 = vst.msk [vmem:[#allocation2 + $0x8] sm:$0xff] %vm19_vm0, %v109_v12 }
  0xee   :  { %v116_v15 = vld [vmem:[#allocation2] sm:$0xff] }
  0xef   :  { %v125_v16 = vadd.f32 %v148_v14, %v116_v15 }
  0xf0   :  { %v117_v17 = vld [vmem:[#allocation2 + $0x8] sm:$0xff] }
  0xf1   :  { %v151_v18 = vpack.c.bf16 %v125_v16, %v125_v16  ;;  %v126_v19 = vadd.f32 %v148_v14, %v117_v17 }
  0xf3   :  { %136 = vst.msk [vmem:[%s230_s3] sm:$0xf] %vm135_vm3, %v151_v18  ;;  %v152_v20 = vpack.c.bf16 %v126_v19, %v126_v19 }
  0xf5   :  { %137 = vst.msk [vmem:[%s230_s3 + $0x4] sm:$0xf] %vm135_vm3, %v152_v20 }

</bundles_post_ra>
